<compile_context>
chip_gen: v6e
topology: v6e:2x2x1
jax: 0.10.0
libtpu: 0.0.40
codegen_flags: <defaults>
</compile_context>

<pallas_src>
import math

import numpy as np
import jax
import jax.numpy as jnp
from jax import lax
from jax.experimental import pallas as pl
from jax.experimental.pallas import tpu as pltpu

# ----------------------------- configuration ------------------------------
B = 2          # batch
S_TGT = 8      # target sequence length
S_MEM = 16     # memory (encoder) sequence length
D_MODEL = 32   # embedding dim
NHEAD = 4      # attention heads
DIM_FF = 64    # feedforward hidden dim
EPS = 1e-5     # LayerNorm eps (PyTorch default)

HD = D_MODEL // NHEAD          # 8   head dim
SCALE = 1.0 / math.sqrt(HD)
TT = B * S_TGT                 # 16  batch-stacked target tokens
TM = B * S_MEM                 # 32  batch-stacked memory tokens
NK_SA = NHEAD * TT             # 64  fused self-attn score columns (head-major)
NK_CA = NHEAD * TM             # 128 fused cross-attn score columns
LANES = 128
NEG = -1e30


# ------------------------------- kernel ------------------------------------
def _decoder_kernel(tgt_ref, mem_ref, w_ref, b_ref, msa_ref, mca_ref, misc_ref,
                    out_ref):
    inv_d = 1.0 / D_MODEL

    def row(i):                       # one (1,128) bias / LayerNorm row
        return b_ref[i:i + 1, :]

    def mm(a, bm):
        return jnp.dot(a, bm, preferred_element_type=jnp.float32)

    def mm_nt(a, bm):                 # contract last dim of both (trans_b semantics)
        return lax.dot_general(a, bm, (((1,), (1,)), ((), ())),
                               preferred_element_type=jnp.float32)

    def layer_norm(x, g_row, b_row):
        # sum / sum-of-squares with explicit /D: zero pad lanes don't corrupt
        # mean/var, and pad lanes come out exactly zero (gamma/beta pad = 0).
        mu = jnp.sum(x, axis=-1, keepdims=True) * inv_d
        ms = jnp.sum(x * x, axis=-1, keepdims=True) * inv_d
        return (x - mu) * lax.rsqrt(ms - mu * mu + EPS) * row(g_row) + row(b_row)

    seg_bcast = misc_ref[2][:NHEAD, :]                      # (4,128) head->out-lane map

    def attention(q, kv, rep, kvmask, seg, bias):
        # q:  (Sq,128)  nonzero only in lanes 0:32  (per-head Q features)
        # kv: (Skv,128) K in lanes 0:32, V in lanes 32:64, zero elsewhere
        kv_rep = mm(rep, kv) * kvmask                       # (nk,128) replicate + mask
        s = mm_nt(q, kv_rep) * SCALE + bias                 # (Sq,nk) fused per-head scores
        e = jnp.exp(s - jnp.max(s, axis=-1, keepdims=True))
        denom = mm(e, seg)                                  # (Sq,NHEAD)
        r = pl.reciprocal(jnp.maximum(denom, 1e-30), approx=True)   # EUP
        out_un = mm(e, kv_rep)                              # (Sq,128) valid in lanes 32:64
        return out_un * mm(r, seg_bcast)                    # normalized, zero elsewhere

    x0 = tgt_ref[...]                                       # (TT,128), pad lanes zero
    mem = mem_ref[...]                                      # (TM,128)

    # ---- self-attention (causal within each batch element) ----
    q_sa = mm(x0, w_ref[0]) + row(0)
    kv_sa = mm(x0, w_ref[1]) + row(1)
    att = attention(q_sa, kv_sa, msa_ref[0][:, :TT], msa_ref[1],
                    msa_ref[2][:, :NHEAD], misc_ref[1][:, :NK_SA])
    x1 = layer_norm(x0 + mm(att, w_ref[2]) + row(2), 8, 9)      # dropout1 == identity

    # ---- cross-attention (memory, batch-restricted, no causal mask) ----
    q_ca = mm(x1, w_ref[3]) + row(3)
    kv_ca = mm(mem, w_ref[4]) + row(4)
    att = attention(q_ca, kv_ca, mca_ref[0][:, :TM], mca_ref[1],
                    mca_ref[2][:, :NHEAD], misc_ref[0])
    x2 = layer_norm(x1 + mm(att, w_ref[5]) + row(5), 10, 11)    # dropout2 == identity

    # ---- feed-forward: Linear -> ReLU -> Linear ----
    hidden = jnp.maximum(mm(x2, w_ref[6]) + row(6), 0.0)
    out_ref[...] = layer_norm(x2 + mm(hidden, w_ref[7]) + row(7), 12, 13)


# ------------------------------- wrapper ------------------------------------
def decoder_layer(tgt, memory, w_slab, b_slab, msa, mca, misc):
    # stack batch on the sublane axis and pad features to 128 lanes (lane-dense IO)
    tgt_p = jnp.zeros((TT, LANES), jnp.float32).at[:, :D_MODEL].set(
        tgt.reshape(TT, D_MODEL))
    mem_p = jnp.zeros((TM, LANES), jnp.float32).at[:, :D_MODEL].set(
        memory.reshape(TM, D_MODEL))

    out_p = pl.pallas_call(
        _decoder_kernel,
        out_shape=jax.ShapeDtypeStruct((TT, LANES), jnp.float32),
        grid_spec=pltpu.PrefetchScalarGridSpec(
            num_scalar_prefetch=0,
            grid=(1,),                                   # single step: whole problem in VMEM
            in_specs=[
                pl.BlockSpec((TT, LANES), lambda i: (0, 0)),
                pl.BlockSpec((TM, LANES), lambda i: (0, 0)),
                pl.BlockSpec(w_slab.shape, lambda i: (0, 0, 0)),
                pl.BlockSpec(b_slab.shape, lambda i: (0, 0)),
                pl.BlockSpec(msa.shape, lambda i: (0, 0, 0)),
                pl.BlockSpec(mca.shape, lambda i: (0, 0, 0)),
                pl.BlockSpec(misc.shape, lambda i: (0, 0, 0)),
            ],
            out_specs=pl.BlockSpec((TT, LANES), lambda i: (0, 0)),
        ),
        compiler_params=pltpu.CompilerParams(
            dimension_semantics=("arbitrary",)),
    )(tgt_p, mem_p, w_slab, b_slab, msa, mca, misc)

    return out_p[:, :D_MODEL].reshape(B, S_TGT, D_MODEL)


# --------------------- parameters: init + slab packing ----------------------
def init_params(key):
    keys = jax.random.split(key, 32)
    ki = iter(keys)

    def lin(k, fan_in, fan_out):
        bound = 1.0 / math.sqrt(fan_in)
        w = jax.random.uniform(k, (fan_in, fan_out), jnp.float32, -bound, bound)
        bvec = jax.random.uniform(jax.random.fold_in(k, 1), (fan_out,),
                                  jnp.float32, -bound, bound)
        return w, bvec

    p = {}
    for prefix in ("sa", "ca"):
        for name in ("q", "k", "v", "o"):
            w, bvec = lin(next(ki), D_MODEL, D_MODEL)
            p[f"{prefix}_w{name}"] = w
            p[f"{prefix}_b{name}"] = bvec
    p["ff_w1"], p["ff_b1"] = lin(next(ki), D_MODEL, DIM_FF)
    p["ff_w2"], p["ff_b2"] = lin(next(ki), DIM_FF, D_MODEL)
    for i in (1, 2, 3):
        p[f"g{i}"] = 1.0 + 0.1 * jax.random.normal(next(ki), (D_MODEL,), jnp.float32)
        p[f"be{i}"] = 0.1 * jax.random.normal(next(ki), (D_MODEL,), jnp.float32)
    return p


def pack_params(p):
    """Pack all weights into (8,128,128) lane-dense slots and biases/LN into (16,128).

    Output-projection weights sit at rows 32:64 because the fused attention writes
    the concatenated per-head outputs into lanes 32:64."""
    w = np.zeros((8, 128, 128), np.float32)

    def put(slot, r0, mat):
        m = np.asarray(mat)
        w[slot, r0:r0 + m.shape[0], :m.shape[1]] = m

    put(0, 0, p["sa_wq"])
    put(1, 0, np.concatenate([np.asarray(p["sa_wk"]), np.asarray(p["sa_wv"])], axis=1))
    put(2, D_MODEL, p["sa_wo"])
    put(3, 0, p["ca_wq"])
    put(4, 0, np.concatenate([np.asarray(p["ca_wk"]), np.asarray(p["ca_wv"])], axis=1))
    put(5, D_MODEL, p["ca_wo"])
    put(6, 0, p["ff_w1"])
    put(7, 0, p["ff_w2"])

    b = np.zeros((16, 128), np.float32)

    def putb(r, vec):
        v = np.asarray(vec).reshape(-1)
        b[r, :v.shape[0]] = v

    putb(0, p["sa_bq"])
    putb(1, np.concatenate([np.asarray(p["sa_bk"]), np.asarray(p["sa_bv"])]))
    putb(2, p["sa_bo"])
    putb(3, p["ca_bq"])
    putb(4, np.concatenate([np.asarray(p["ca_bk"]), np.asarray(p["ca_bv"])]))
    putb(5, p["ca_bo"])
    putb(6, p["ff_b1"])
    putb(7, p["ff_b2"])
    putb(8, p["g1"]);  putb(9, p["be1"])
    putb(10, p["g2"]); putb(11, p["be2"])
    putb(12, p["g3"]); putb(13, p["be3"])
    return jnp.asarray(w), jnp.asarray(b)


def build_masks():
    """Precompute every static selector / mask / bias tensor used by the kernel."""
    c = np.arange(LANES)[None, :]

    def kv_lane_mask(h):
        # row block of head h keeps its K lanes (0:32) and V lanes (32:64)
        return (((c < D_MODEL) & (c // HD == h[:, None])) |
                ((c >= D_MODEL) & (c < 2 * D_MODEL) &
                 ((c - D_MODEL) // HD == h[:, None]))).astype(np.float32)

    # ---- self-attention: fused score column j = h*TT + t (head-major) ----
    j = np.arange(NK_SA)
    h = j // TT
    t = j % TT
    rep_sa = (t[:, None] == np.arange(TT)[None, :]).astype(np.float32)      # (64,16)
    kvmask_sa = kv_lane_mask(h)                                             # (64,128)
    seg_sa = (h[:, None] == np.arange(NHEAD)[None, :]).astype(np.float32)   # (64,4)
    qi = np.arange(TT)
    ok = ((qi[:, None] // S_TGT == t[None, :] // S_TGT) &
          (t[None, :] % S_TGT <= qi[:, None] % S_TGT))                      # batch & causal
    bias_sa = np.where(ok, 0.0, NEG).astype(np.float32)                     # (16,64)

    # ---- cross-attention: fused score column j = h*TM + t ----
    j = np.arange(NK_CA)
    h = j // TM
    t = j % TM
    rep_ca = (t[:, None] == np.arange(TM)[None, :]).astype(np.float32)      # (128,32)
    kvmask_ca = kv_lane_mask(h)                                             # (128,128)
    seg_ca = (h[:, None] == np.arange(NHEAD)[None, :]).astype(np.float32)   # (128,4)
    ok = (qi[:, None] // S_TGT == t[None, :] // S_MEM)                      # same batch only
    bias_ca = np.where(ok, 0.0, NEG).astype(np.float32)                     # (16,128)

    # per-head 1/denominator broadcast onto the attention-output lanes (32:64)
    segf = np.zeros((NHEAD, LANES), np.float32)
    for hh in range(NHEAD):
        segf[hh, D_MODEL + hh * HD: D_MODEL + (hh + 1) * HD] = 1.0

    msa = np.zeros((3, NK_SA, LANES), np.float32)
    msa[0, :, :TT] = rep_sa
    msa[1] = kvmask_sa
    msa[2, :, :NHEAD] = seg_sa

    mca = np.zeros((3, NK_CA, LANES), np.float32)
    mca[0, :, :TM] = rep_ca
    mca[1] = kvmask_ca
    mca[2, :, :NHEAD] = seg_ca

    misc = np.zeros((3, TT, LANES), np.float32)
    misc[0] = bias_ca
    misc[1, :, :NK_SA] = bias_sa
    misc[2, :NHEAD, :] = segf
    return jnp.asarray(msa), jnp.asarray(mca), jnp.asarray(misc)


# --------------------------- pure-JAX reference -----------------------------
# Straightforward per-head formulation (independent of the kernel's fused-head
# algebra) so allclose genuinely checks the kernel's math.
def _ref_layer_norm(x, g, be):
    mu = jnp.mean(x, axis=-1, keepdims=True)
    var = jnp.mean((x - mu) ** 2, axis=-1, keepdims=True)
    return (x - mu) / jnp.sqrt(var + EPS) * g + be


def _ref_mha(xq, xkv, wq, bq, wk, bk, wv, bv, wo, bo, nhead, mask):
    hi = lax.Precision.HIGHEST
    sq, d = xq.shape
    skv = xkv.shape[0]
    hd = d // nhead
    q = jnp.dot(xq, wq, precision=hi) + bq
    k = jnp.dot(xkv, wk, precision=hi) + bk
    v = jnp.dot(xkv, wv, precision=hi) + bv
    qh = q.reshape(sq, nhead, hd).transpose(1, 0, 2)
    kh = k.reshape(skv, nhead, hd).transpose(1, 0, 2)
    vh = v.reshape(skv, nhead, hd).transpose(1, 0, 2)
    s = jnp.einsum("hqd,hkd->hqk", qh, kh, precision=hi) / math.sqrt(hd)
    if mask is not None:
        s = jnp.where(mask[None, :, :], s, -jnp.inf)
    attn = jax.nn.softmax(s, axis=-1)
    o = jnp.einsum("hqk,hkd->hqd", attn, vh, precision=hi)
    o = o.transpose(1, 0, 2).reshape(sq, d)
    return jnp.dot(o, wo, precision=hi) + bo


def reference(tgt, memory, p):
    hi = lax.Precision.HIGHEST

    def one(t, m):
        s = t.shape[0]
        causal = jnp.tril(jnp.ones((s, s), dtype=bool))
        sa = _ref_mha(t, t, p["sa_wq"], p["sa_bq"], p["sa_wk"], p["sa_bk"],
                      p["sa_wv"], p["sa_bv"], p["sa_wo"], p["sa_bo"], NHEAD, causal)
        x = _ref_layer_norm(t + sa, p["g1"], p["be1"])
        ca = _ref_mha(x, m, p["ca_wq"], p["ca_bq"], p["ca_wk"], p["ca_bk"],
                      p["ca_wv"], p["ca_bv"], p["ca_wo"], p["ca_bo"], NHEAD, None)
        x = _ref_layer_norm(x + ca, p["g2"], p["be2"])
        h = jax.nn.relu(jnp.dot(x, p["ff_w1"], precision=hi) + p["ff_b1"])
        y = jnp.dot(h, p["ff_w2"], precision=hi) + p["ff_b2"]
        return _ref_layer_norm(x + y, p["g3"], p["be3"])

    return jax.vmap(one)(tgt, memory)


if __name__ == "__main__":
    key = jax.random.PRNGKey(0)
    k_t, k_m, k_p = jax.random.split(key, 3)
    tgt = jax.random.normal(k_t, (B, S_TGT, D_MODEL), jnp.float32)
    memory = jax.random.normal(k_m, (B, S_MEM, D_MODEL), jnp.float32)
    params = init_params(k_p)
    w_slab, b_slab = pack_params(params)
    msa, mca, misc = build_masks()

    run = jax.jit(decoder_layer)
    out = jax.block_until_ready(run(tgt, memory, w_slab, b_slab, msa, mca, misc))
    ref = jax.block_until_ready(reference(tgt, memory, params))

    assert out.shape == (B, S_TGT, D_MODEL)
    assert bool(jnp.all(jnp.isfinite(out)))
    max_err = float(jnp.max(jnp.abs(out - ref)))
    # tolerance covers the approximate-reciprocal softmax divide (EUP vrcp)
    assert jnp.allclose(out, ref, atol=3e-3, rtol=3e-3), f"max abs err = {max_err}"
    print("KERNEL_OK")
</pallas_src>

<mosaic_0001>
module attributes {stable_mosaic.version = 11 : i64} {
  func.func @_decoder_kernel(%arg0: i32, %arg1: memref<16x128xf32, #tpu.memory_space<vmem>>, %arg2: memref<32x128xf32, #tpu.memory_space<vmem>>, %arg3: memref<8x128x128xf32, #tpu.memory_space<vmem>>, %arg4: memref<16x128xf32, #tpu.memory_space<vmem>>, %arg5: memref<3x64x128xf32, #tpu.memory_space<vmem>>, %arg6: memref<3x128x128xf32, #tpu.memory_space<vmem>>, %arg7: memref<3x16x128xf32, #tpu.memory_space<vmem>>, %arg8: memref<16x128xf32, #tpu.memory_space<vmem>>) attributes {dimension_semantics = [#tpu.dimension_semantics<arbitrary>], iteration_bounds = array<i64: 1>, scalar_prefetch = 0 : i64, scratch_operands = 0 : i64, tpu.core_type = #tpu.core_type<tc>, window_params = [{pipeline_mode = #tpu.pipeline_mode<synchronous>, transform_indices = @transform_0, window_bounds = array<i64: 16, 128>}, {pipeline_mode = #tpu.pipeline_mode<synchronous>, transform_indices = @transform_1, window_bounds = array<i64: 32, 128>}, {pipeline_mode = #tpu.pipeline_mode<synchronous>, transform_indices = @transform_2, window_bounds = array<i64: 8, 128, 128>}, {pipeline_mode = #tpu.pipeline_mode<synchronous>, transform_indices = @transform_3, window_bounds = array<i64: 16, 128>}, {pipeline_mode = #tpu.pipeline_mode<synchronous>, transform_indices = @transform_4, window_bounds = array<i64: 3, 64, 128>}, {pipeline_mode = #tpu.pipeline_mode<synchronous>, transform_indices = @transform_5, window_bounds = array<i64: 3, 128, 128>}, {pipeline_mode = #tpu.pipeline_mode<synchronous>, transform_indices = @transform_6, window_bounds = array<i64: 3, 16, 128>}, {pipeline_mode = #tpu.pipeline_mode<synchronous>, transform_indices = @transform_7, window_bounds = array<i64: 16, 128>}]} {
    %c2 = arith.constant 2 : index
    %c0 = arith.constant 0 : index
    %c0_0 = arith.constant 0 : index
    %0 = vector.load %arg7[%c2, %c0, %c0_0] : memref<3x16x128xf32, #tpu.memory_space<vmem>>, vector<1x16x128xf32>
    %1 = vector.shape_cast %0 : vector<1x16x128xf32> to vector<16x128xf32>
    %2 = vector.extract_strided_slice %1 {offsets = [0, 0], sizes = [4, 128], strides = [1, 1]} : vector<16x128xf32> to vector<4x128xf32>
    %c0_1 = arith.constant 0 : index
    %c0_2 = arith.constant 0 : index
    %3 = vector.load %arg1[%c0_1, %c0_2] : memref<16x128xf32, #tpu.memory_space<vmem>>, vector<16x128xf32>
    %c0_3 = arith.constant 0 : index
    %c0_4 = arith.constant 0 : index
    %4 = vector.load %arg2[%c0_3, %c0_4] : memref<32x128xf32, #tpu.memory_space<vmem>>, vector<32x128xf32>
    %c0_5 = arith.constant 0 : index
    %c0_6 = arith.constant 0 : index
    %c0_7 = arith.constant 0 : index
    %5 = vector.load %arg3[%c0_5, %c0_6, %c0_7] : memref<8x128x128xf32, #tpu.memory_space<vmem>>, vector<1x128x128xf32>
    %6 = vector.shape_cast %5 : vector<1x128x128xf32> to vector<128x128xf32>
    %cst = arith.constant dense<0.000000e+00> : vector<16x128xf32>
    %7 = tpu.matmul %3, %6, %cst {dimension_numbers = #tpu.dot_dimension_numbers<[1], [0], [0], [1], [0, 0, 1, 1], [], []>} : vector<16x128xf32>, vector<128x128xf32>, vector<16x128xf32> -> vector<16x128xf32>
    %c0_8 = arith.constant 0 : index
    %c0_9 = arith.constant 0 : index
    %8 = vector.load %arg4[%c0_8, %c0_9] : memref<16x128xf32, #tpu.memory_space<vmem>>, vector<1x128xf32>
    %9 = vector.broadcast %8 : vector<1x128xf32> to vector<16x128xf32>
    %10 = arith.addf %7, %9 : vector<16x128xf32>
    %c1 = arith.constant 1 : index
    %c0_10 = arith.constant 0 : index
    %c0_11 = arith.constant 0 : index
    %11 = vector.load %arg3[%c1, %c0_10, %c0_11] : memref<8x128x128xf32, #tpu.memory_space<vmem>>, vector<1x128x128xf32>
    %12 = vector.shape_cast %11 : vector<1x128x128xf32> to vector<128x128xf32>
    %cst_12 = arith.constant dense<0.000000e+00> : vector<16x128xf32>
    %13 = tpu.matmul %3, %12, %cst_12 {dimension_numbers = #tpu.dot_dimension_numbers<[1], [0], [0], [1], [0, 0, 1, 1], [], []>} : vector<16x128xf32>, vector<128x128xf32>, vector<16x128xf32> -> vector<16x128xf32>
    %c1_13 = arith.constant 1 : index
    %c0_14 = arith.constant 0 : index
    %14 = vector.load %arg4[%c1_13, %c0_14] : memref<16x128xf32, #tpu.memory_space<vmem>>, vector<1x128xf32>
    %15 = vector.broadcast %14 : vector<1x128xf32> to vector<16x128xf32>
    %16 = arith.addf %13, %15 : vector<16x128xf32>
    %c0_15 = arith.constant 0 : index
    %c0_16 = arith.constant 0 : index
    %c0_17 = arith.constant 0 : index
    %17 = vector.load %arg5[%c0_15, %c0_16, %c0_17] : memref<3x64x128xf32, #tpu.memory_space<vmem>>, vector<1x64x128xf32>
    %18 = vector.shape_cast %17 : vector<1x64x128xf32> to vector<64x128xf32>
    %19 = vector.extract_strided_slice %18 {offsets = [0, 0], sizes = [64, 16], strides = [1, 1]} : vector<64x128xf32> to vector<64x16xf32>
    %c1_18 = arith.constant 1 : index
    %c0_19 = arith.constant 0 : index
    %c0_20 = arith.constant 0 : index
    %20 = vector.load %arg5[%c1_18, %c0_19, %c0_20] : memref<3x64x128xf32, #tpu.memory_space<vmem>>, vector<1x64x128xf32>
    %21 = vector.shape_cast %20 : vector<1x64x128xf32> to vector<64x128xf32>
    %c2_21 = arith.constant 2 : index
    %c0_22 = arith.constant 0 : index
    %c0_23 = arith.constant 0 : index
    %22 = vector.load %arg5[%c2_21, %c0_22, %c0_23] : memref<3x64x128xf32, #tpu.memory_space<vmem>>, vector<1x64x128xf32>
    %23 = vector.shape_cast %22 : vector<1x64x128xf32> to vector<64x128xf32>
    %24 = vector.extract_strided_slice %23 {offsets = [0, 0], sizes = [64, 4], strides = [1, 1]} : vector<64x128xf32> to vector<64x4xf32>
    %c1_24 = arith.constant 1 : index
    %c0_25 = arith.constant 0 : index
    %c0_26 = arith.constant 0 : index
    %25 = vector.load %arg7[%c1_24, %c0_25, %c0_26] : memref<3x16x128xf32, #tpu.memory_space<vmem>>, vector<1x16x128xf32>
    %26 = vector.shape_cast %25 : vector<1x16x128xf32> to vector<16x128xf32>
    %27 = vector.extract_strided_slice %26 {offsets = [0, 0], sizes = [16, 64], strides = [1, 1]} : vector<16x128xf32> to vector<16x64xf32>
    %cst_27 = arith.constant dense<0.000000e+00> : vector<64x128xf32>
    %28 = tpu.matmul %19, %16, %cst_27 {dimension_numbers = #tpu.dot_dimension_numbers<[1], [0], [0], [1], [0, 0, 1, 1], [], []>} : vector<64x16xf32>, vector<16x128xf32>, vector<64x128xf32> -> vector<64x128xf32>
    %29 = arith.mulf %28, %21 : vector<64x128xf32>
    %cst_28 = arith.constant dense<0.000000e+00> : vector<16x64xf32>
    %30 = tpu.matmul %10, %29, %cst_28 {dimension_numbers = #tpu.dot_dimension_numbers<[1], [1], [0], [0], [0, 0, 1, 0], [], []>} : vector<16x128xf32>, vector<64x128xf32>, vector<16x64xf32> -> vector<16x64xf32>
    %cst_29 = arith.constant 0.353553385 : f32
    %31 = vector.broadcast %cst_29 : f32 to vector<16x64xf32>
    %32 = arith.mulf %30, %31 : vector<16x64xf32>
    %33 = arith.addf %32, %27 : vector<16x64xf32>
    %cst_30 = arith.constant dense<0xFF800000> : vector<16xf32>
    %34 = vector.multi_reduction <maximumf>, %33, %cst_30 [1] : vector<16x64xf32> to vector<16xf32>
    %35 = vector.shape_cast %34 : vector<16xf32> to vector<16x1xf32>
    %36 = vector.broadcast %35 : vector<16x1xf32> to vector<16x64xf32>
    %37 = arith.subf %33, %36 : vector<16x64xf32>
    %38 = math.exp %37 : vector<16x64xf32>
    %cst_31 = arith.constant dense<0.000000e+00> : vector<16x4xf32>
    %39 = tpu.matmul %38, %24, %cst_31 {dimension_numbers = #tpu.dot_dimension_numbers<[1], [0], [0], [1], [0, 0, 1, 1], [], []>} : vector<16x64xf32>, vector<64x4xf32>, vector<16x4xf32> -> vector<16x4xf32>
    %cst_32 = arith.constant 1.000000e-30 : f32
    %40 = vector.broadcast %cst_32 : f32 to vector<16x4xf32>
    %41 = arith.maximumf %39, %40 : vector<16x4xf32>
    %42 = tpu.reciprocal %41 {approx = true} : vector<16x4xf32> -> vector<16x4xf32>
    %cst_33 = arith.constant dense<0.000000e+00> : vector<16x128xf32>
    %43 = tpu.matmul %38, %29, %cst_33 {dimension_numbers = #tpu.dot_dimension_numbers<[1], [0], [0], [1], [0, 0, 1, 1], [], []>} : vector<16x64xf32>, vector<64x128xf32>, vector<16x128xf32> -> vector<16x128xf32>
    %cst_34 = arith.constant dense<0.000000e+00> : vector<16x128xf32>
    %44 = tpu.matmul %42, %2, %cst_34 {dimension_numbers = #tpu.dot_dimension_numbers<[1], [0], [0], [1], [0, 0, 1, 1], [], []>} : vector<16x4xf32>, vector<4x128xf32>, vector<16x128xf32> -> vector<16x128xf32>
    %45 = arith.mulf %43, %44 : vector<16x128xf32>
    %c2_35 = arith.constant 2 : index
    %c0_36 = arith.constant 0 : index
    %c0_37 = arith.constant 0 : index
    %46 = vector.load %arg3[%c2_35, %c0_36, %c0_37] : memref<8x128x128xf32, #tpu.memory_space<vmem>>, vector<1x128x128xf32>
    %47 = vector.shape_cast %46 : vector<1x128x128xf32> to vector<128x128xf32>
    %cst_38 = arith.constant dense<0.000000e+00> : vector<16x128xf32>
    %48 = tpu.matmul %45, %47, %cst_38 {dimension_numbers = #tpu.dot_dimension_numbers<[1], [0], [0], [1], [0, 0, 1, 1], [], []>} : vector<16x128xf32>, vector<128x128xf32>, vector<16x128xf32> -> vector<16x128xf32>
    %49 = arith.addf %3, %48 : vector<16x128xf32>
    %c2_39 = arith.constant 2 : index
    %c0_40 = arith.constant 0 : index
    %50 = vector.load %arg4[%c2_39, %c0_40] : memref<16x128xf32, #tpu.memory_space<vmem>>, vector<1x128xf32>
    %51 = vector.broadcast %50 : vector<1x128xf32> to vector<16x128xf32>
    %52 = arith.addf %49, %51 : vector<16x128xf32>
    %cst_41 = arith.constant dense<0.000000e+00> : vector<16xf32>
    %53 = vector.multi_reduction <add>, %52, %cst_41 [1] : vector<16x128xf32> to vector<16xf32>
    %54 = vector.shape_cast %53 : vector<16xf32> to vector<16x1xf32>
    %cst_42 = arith.constant 3.125000e-02 : f32
    %55 = vector.broadcast %cst_42 : f32 to vector<16x1xf32>
    %56 = arith.mulf %54, %55 : vector<16x1xf32>
    %57 = arith.mulf %52, %52 : vector<16x128xf32>
    %cst_43 = arith.constant dense<0.000000e+00> : vector<16xf32>
    %58 = vector.multi_reduction <add>, %57, %cst_43 [1] : vector<16x128xf32> to vector<16xf32>
    %59 = vector.shape_cast %58 : vector<16xf32> to vector<16x1xf32>
    %cst_44 = arith.constant 3.125000e-02 : f32
    %60 = vector.broadcast %cst_44 : f32 to vector<16x1xf32>
    %61 = arith.mulf %59, %60 : vector<16x1xf32>
    %62 = vector.broadcast %56 : vector<16x1xf32> to vector<16x128xf32>
    %63 = arith.subf %52, %62 : vector<16x128xf32>
    %64 = arith.mulf %56, %56 : vector<16x1xf32>
    %65 = arith.subf %61, %64 : vector<16x1xf32>
    %cst_45 = arith.constant 9.99999974E-6 : f32
    %66 = vector.broadcast %cst_45 : f32 to vector<16x1xf32>
    %67 = arith.addf %65, %66 : vector<16x1xf32>
    %68 = math.rsqrt %67 : vector<16x1xf32>
    %69 = vector.broadcast %68 : vector<16x1xf32> to vector<16x128xf32>
    %70 = arith.mulf %63, %69 : vector<16x128xf32>
    %c8 = arith.constant 8 : index
    %c0_46 = arith.constant 0 : index
    %71 = vector.load %arg4[%c8, %c0_46] : memref<16x128xf32, #tpu.memory_space<vmem>>, vector<1x128xf32>
    %72 = vector.broadcast %71 : vector<1x128xf32> to vector<16x128xf32>
    %73 = arith.mulf %70, %72 : vector<16x128xf32>
    %c9 = arith.constant 9 : index
    %c0_47 = arith.constant 0 : index
    %74 = vector.load %arg4[%c9, %c0_47] : memref<16x128xf32, #tpu.memory_space<vmem>>, vector<1x128xf32>
    %75 = vector.broadcast %74 : vector<1x128xf32> to vector<16x128xf32>
    %76 = arith.addf %73, %75 : vector<16x128xf32>
    %c3 = arith.constant 3 : index
    %c0_48 = arith.constant 0 : index
    %c0_49 = arith.constant 0 : index
    %77 = vector.load %arg3[%c3, %c0_48, %c0_49] : memref<8x128x128xf32, #tpu.memory_space<vmem>>, vector<1x128x128xf32>
    %78 = vector.shape_cast %77 : vector<1x128x128xf32> to vector<128x128xf32>
    %cst_50 = arith.constant dense<0.000000e+00> : vector<16x128xf32>
    %79 = tpu.matmul %76, %78, %cst_50 {dimension_numbers = #tpu.dot_dimension_numbers<[1], [0], [0], [1], [0, 0, 1, 1], [], []>} : vector<16x128xf32>, vector<128x128xf32>, vector<16x128xf32> -> vector<16x128xf32>
    %c3_51 = arith.constant 3 : index
    %c0_52 = arith.constant 0 : index
    %80 = vector.load %arg4[%c3_51, %c0_52] : memref<16x128xf32, #tpu.memory_space<vmem>>, vector<1x128xf32>
    %81 = vector.broadcast %80 : vector<1x128xf32> to vector<16x128xf32>
    %82 = arith.addf %79, %81 : vector<16x128xf32>
    %c4 = arith.constant 4 : index
    %c0_53 = arith.constant 0 : index
    %c0_54 = arith.constant 0 : index
    %83 = vector.load %arg3[%c4, %c0_53, %c0_54] : memref<8x128x128xf32, #tpu.memory_space<vmem>>, vector<1x128x128xf32>
    %84 = vector.shape_cast %83 : vector<1x128x128xf32> to vector<128x128xf32>
    %cst_55 = arith.constant dense<0.000000e+00> : vector<32x128xf32>
    %85 = tpu.matmul %4, %84, %cst_55 {dimension_numbers = #tpu.dot_dimension_numbers<[1], [0], [0], [1], [0, 0, 1, 1], [], []>} : vector<32x128xf32>, vector<128x128xf32>, vector<32x128xf32> -> vector<32x128xf32>
    %c4_56 = arith.constant 4 : index
    %c0_57 = arith.constant 0 : index
    %86 = vector.load %arg4[%c4_56, %c0_57] : memref<16x128xf32, #tpu.memory_space<vmem>>, vector<1x128xf32>
    %87 = vector.broadcast %86 : vector<1x128xf32> to vector<32x128xf32>
    %88 = arith.addf %85, %87 : vector<32x128xf32>
    %c0_58 = arith.constant 0 : index
    %c0_59 = arith.constant 0 : index
    %c0_60 = arith.constant 0 : index
    %89 = vector.load %arg6[%c0_58, %c0_59, %c0_60] : memref<3x128x128xf32, #tpu.memory_space<vmem>>, vector<1x128x128xf32>
    %90 = vector.shape_cast %89 : vector<1x128x128xf32> to vector<128x128xf32>
    %91 = vector.extract_strided_slice %90 {offsets = [0, 0], sizes = [128, 32], strides = [1, 1]} : vector<128x128xf32> to vector<128x32xf32>
    %c1_61 = arith.constant 1 : index
    %c0_62 = arith.constant 0 : index
    %c0_63 = arith.constant 0 : index
    %92 = vector.load %arg6[%c1_61, %c0_62, %c0_63] : memref<3x128x128xf32, #tpu.memory_space<vmem>>, vector<1x128x128xf32>
    %93 = vector.shape_cast %92 : vector<1x128x128xf32> to vector<128x128xf32>
    %c2_64 = arith.constant 2 : index
    %c0_65 = arith.constant 0 : index
    %c0_66 = arith.constant 0 : index
    %94 = vector.load %arg6[%c2_64, %c0_65, %c0_66] : memref<3x128x128xf32, #tpu.memory_space<vmem>>, vector<1x128x128xf32>
    %95 = vector.shape_cast %94 : vector<1x128x128xf32> to vector<128x128xf32>
    %96 = vector.extract_strided_slice %95 {offsets = [0, 0], sizes = [128, 4], strides = [1, 1]} : vector<128x128xf32> to vector<128x4xf32>
    %c0_67 = arith.constant 0 : index
    %c0_68 = arith.constant 0 : index
    %c0_69 = arith.constant 0 : index
    %97 = vector.load %arg7[%c0_67, %c0_68, %c0_69] : memref<3x16x128xf32, #tpu.memory_space<vmem>>, vector<1x16x128xf32>
    %98 = vector.shape_cast %97 : vector<1x16x128xf32> to vector<16x128xf32>
    %cst_70 = arith.constant dense<0.000000e+00> : vector<128x128xf32>
    %99 = tpu.matmul %91, %88, %cst_70 {dimension_numbers = #tpu.dot_dimension_numbers<[1], [0], [0], [1], [0, 0, 1, 1], [], []>} : vector<128x32xf32>, vector<32x128xf32>, vector<128x128xf32> -> vector<128x128xf32>
    %100 = arith.mulf %99, %93 : vector<128x128xf32>
    %cst_71 = arith.constant dense<0.000000e+00> : vector<16x128xf32>
    %101 = tpu.matmul %82, %100, %cst_71 {dimension_numbers = #tpu.dot_dimension_numbers<[1], [1], [0], [0], [0, 0, 1, 0], [], []>} : vector<16x128xf32>, vector<128x128xf32>, vector<16x128xf32> -> vector<16x128xf32>
    %cst_72 = arith.constant 0.353553385 : f32
    %102 = vector.broadcast %cst_72 : f32 to vector<16x128xf32>
    %103 = arith.mulf %101, %102 : vector<16x128xf32>
    %104 = arith.addf %103, %98 : vector<16x128xf32>
    %cst_73 = arith.constant dense<0xFF800000> : vector<16xf32>
    %105 = vector.multi_reduction <maximumf>, %104, %cst_73 [1] : vector<16x128xf32> to vector<16xf32>
    %106 = vector.shape_cast %105 : vector<16xf32> to vector<16x1xf32>
    %107 = vector.broadcast %106 : vector<16x1xf32> to vector<16x128xf32>
    %108 = arith.subf %104, %107 : vector<16x128xf32>
    %109 = math.exp %108 : vector<16x128xf32>
    %cst_74 = arith.constant dense<0.000000e+00> : vector<16x4xf32>
    %110 = tpu.matmul %109, %96, %cst_74 {dimension_numbers = #tpu.dot_dimension_numbers<[1], [0], [0], [1], [0, 0, 1, 1], [], []>} : vector<16x128xf32>, vector<128x4xf32>, vector<16x4xf32> -> vector<16x4xf32>
    %cst_75 = arith.constant 1.000000e-30 : f32
    %111 = vector.broadcast %cst_75 : f32 to vector<16x4xf32>
    %112 = arith.maximumf %110, %111 : vector<16x4xf32>
    %113 = tpu.reciprocal %112 {approx = true} : vector<16x4xf32> -> vector<16x4xf32>
    %cst_76 = arith.constant dense<0.000000e+00> : vector<16x128xf32>
    %114 = tpu.matmul %109, %100, %cst_76 {dimension_numbers = #tpu.dot_dimension_numbers<[1], [0], [0], [1], [0, 0, 1, 1], [], []>} : vector<16x128xf32>, vector<128x128xf32>, vector<16x128xf32> -> vector<16x128xf32>
    %cst_77 = arith.constant dense<0.000000e+00> : vector<16x128xf32>
    %115 = tpu.matmul %113, %2, %cst_77 {dimension_numbers = #tpu.dot_dimension_numbers<[1], [0], [0], [1], [0, 0, 1, 1], [], []>} : vector<16x4xf32>, vector<4x128xf32>, vector<16x128xf32> -> vector<16x128xf32>
    %116 = arith.mulf %114, %115 : vector<16x128xf32>
    %c5 = arith.constant 5 : index
    %c0_78 = arith.constant 0 : index
    %c0_79 = arith.constant 0 : index
    %117 = vector.load %arg3[%c5, %c0_78, %c0_79] : memref<8x128x128xf32, #tpu.memory_space<vmem>>, vector<1x128x128xf32>
    %118 = vector.shape_cast %117 : vector<1x128x128xf32> to vector<128x128xf32>
    %cst_80 = arith.constant dense<0.000000e+00> : vector<16x128xf32>
    %119 = tpu.matmul %116, %118, %cst_80 {dimension_numbers = #tpu.dot_dimension_numbers<[1], [0], [0], [1], [0, 0, 1, 1], [], []>} : vector<16x128xf32>, vector<128x128xf32>, vector<16x128xf32> -> vector<16x128xf32>
    %120 = arith.addf %76, %119 : vector<16x128xf32>
    %c5_81 = arith.constant 5 : index
    %c0_82 = arith.constant 0 : index
    %121 = vector.load %arg4[%c5_81, %c0_82] : memref<16x128xf32, #tpu.memory_space<vmem>>, vector<1x128xf32>
    %122 = vector.broadcast %121 : vector<1x128xf32> to vector<16x128xf32>
    %123 = arith.addf %120, %122 : vector<16x128xf32>
    %cst_83 = arith.constant dense<0.000000e+00> : vector<16xf32>
    %124 = vector.multi_reduction <add>, %123, %cst_83 [1] : vector<16x128xf32> to vector<16xf32>
    %125 = vector.shape_cast %124 : vector<16xf32> to vector<16x1xf32>
    %cst_84 = arith.constant 3.125000e-02 : f32
    %126 = vector.broadcast %cst_84 : f32 to vector<16x1xf32>
    %127 = arith.mulf %125, %126 : vector<16x1xf32>
    %128 = arith.mulf %123, %123 : vector<16x128xf32>
    %cst_85 = arith.constant dense<0.000000e+00> : vector<16xf32>
    %129 = vector.multi_reduction <add>, %128, %cst_85 [1] : vector<16x128xf32> to vector<16xf32>
    %130 = vector.shape_cast %129 : vector<16xf32> to vector<16x1xf32>
    %cst_86 = arith.constant 3.125000e-02 : f32
    %131 = vector.broadcast %cst_86 : f32 to vector<16x1xf32>
    %132 = arith.mulf %130, %131 : vector<16x1xf32>
    %133 = vector.broadcast %127 : vector<16x1xf32> to vector<16x128xf32>
    %134 = arith.subf %123, %133 : vector<16x128xf32>
    %135 = arith.mulf %127, %127 : vector<16x1xf32>
    %136 = arith.subf %132, %135 : vector<16x1xf32>
    %cst_87 = arith.constant 9.99999974E-6 : f32
    %137 = vector.broadcast %cst_87 : f32 to vector<16x1xf32>
    %138 = arith.addf %136, %137 : vector<16x1xf32>
    %139 = math.rsqrt %138 : vector<16x1xf32>
    %140 = vector.broadcast %139 : vector<16x1xf32> to vector<16x128xf32>
    %141 = arith.mulf %134, %140 : vector<16x128xf32>
    %c10 = arith.constant 10 : index
    %c0_88 = arith.constant 0 : index
    %142 = vector.load %arg4[%c10, %c0_88] : memref<16x128xf32, #tpu.memory_space<vmem>>, vector<1x128xf32>
    %143 = vector.broadcast %142 : vector<1x128xf32> to vector<16x128xf32>
    %144 = arith.mulf %141, %143 : vector<16x128xf32>
    %c11 = arith.constant 11 : index
    %c0_89 = arith.constant 0 : index
    %145 = vector.load %arg4[%c11, %c0_89] : memref<16x128xf32, #tpu.memory_space<vmem>>, vector<1x128xf32>
    %146 = vector.broadcast %145 : vector<1x128xf32> to vector<16x128xf32>
    %147 = arith.addf %144, %146 : vector<16x128xf32>
    %c6 = arith.constant 6 : index
    %c0_90 = arith.constant 0 : index
    %c0_91 = arith.constant 0 : index
    %148 = vector.load %arg3[%c6, %c0_90, %c0_91] : memref<8x128x128xf32, #tpu.memory_space<vmem>>, vector<1x128x128xf32>
    %149 = vector.shape_cast %148 : vector<1x128x128xf32> to vector<128x128xf32>
    %cst_92 = arith.constant dense<0.000000e+00> : vector<16x128xf32>
    %150 = tpu.matmul %147, %149, %cst_92 {dimension_numbers = #tpu.dot_dimension_numbers<[1], [0], [0], [1], [0, 0, 1, 1], [], []>} : vector<16x128xf32>, vector<128x128xf32>, vector<16x128xf32> -> vector<16x128xf32>
    %c6_93 = arith.constant 6 : index
    %c0_94 = arith.constant 0 : index
    %151 = vector.load %arg4[%c6_93, %c0_94] : memref<16x128xf32, #tpu.memory_space<vmem>>, vector<1x128xf32>
    %152 = vector.broadcast %151 : vector<1x128xf32> to vector<16x128xf32>
    %153 = arith.addf %150, %152 : vector<16x128xf32>
    %cst_95 = arith.constant 0.000000e+00 : f32
    %154 = vector.broadcast %cst_95 : f32 to vector<16x128xf32>
    %155 = arith.maximumf %153, %154 : vector<16x128xf32>
    %c7 = arith.constant 7 : index
    %c0_96 = arith.constant 0 : index
    %c0_97 = arith.constant 0 : index
    %156 = vector.load %arg3[%c7, %c0_96, %c0_97] : memref<8x128x128xf32, #tpu.memory_space<vmem>>, vector<1x128x128xf32>
    %157 = vector.shape_cast %156 : vector<1x128x128xf32> to vector<128x128xf32>
    %cst_98 = arith.constant dense<0.000000e+00> : vector<16x128xf32>
    %158 = tpu.matmul %155, %157, %cst_98 {dimension_numbers = #tpu.dot_dimension_numbers<[1], [0], [0], [1], [0, 0, 1, 1], [], []>} : vector<16x128xf32>, vector<128x128xf32>, vector<16x128xf32> -> vector<16x128xf32>
    %159 = arith.addf %147, %158 : vector<16x128xf32>
    %c7_99 = arith.constant 7 : index
    %c0_100 = arith.constant 0 : index
    %160 = vector.load %arg4[%c7_99, %c0_100] : memref<16x128xf32, #tpu.memory_space<vmem>>, vector<1x128xf32>
    %161 = vector.broadcast %160 : vector<1x128xf32> to vector<16x128xf32>
    %162 = arith.addf %159, %161 : vector<16x128xf32>
    %cst_101 = arith.constant dense<0.000000e+00> : vector<16xf32>
    %163 = vector.multi_reduction <add>, %162, %cst_101 [1] : vector<16x128xf32> to vector<16xf32>
    %164 = vector.shape_cast %163 : vector<16xf32> to vector<16x1xf32>
    %cst_102 = arith.constant 3.125000e-02 : f32
    %165 = vector.broadcast %cst_102 : f32 to vector<16x1xf32>
    %166 = arith.mulf %164, %165 : vector<16x1xf32>
    %167 = arith.mulf %162, %162 : vector<16x128xf32>
    %cst_103 = arith.constant dense<0.000000e+00> : vector<16xf32>
    %168 = vector.multi_reduction <add>, %167, %cst_103 [1] : vector<16x128xf32> to vector<16xf32>
    %169 = vector.shape_cast %168 : vector<16xf32> to vector<16x1xf32>
    %cst_104 = arith.constant 3.125000e-02 : f32
    %170 = vector.broadcast %cst_104 : f32 to vector<16x1xf32>
    %171 = arith.mulf %169, %170 : vector<16x1xf32>
    %172 = vector.broadcast %166 : vector<16x1xf32> to vector<16x128xf32>
    %173 = arith.subf %162, %172 : vector<16x128xf32>
    %174 = arith.mulf %166, %166 : vector<16x1xf32>
    %175 = arith.subf %171, %174 : vector<16x1xf32>
    %cst_105 = arith.constant 9.99999974E-6 : f32
    %176 = vector.broadcast %cst_105 : f32 to vector<16x1xf32>
    %177 = arith.addf %175, %176 : vector<16x1xf32>
    %178 = math.rsqrt %177 : vector<16x1xf32>
    %179 = vector.broadcast %178 : vector<16x1xf32> to vector<16x128xf32>
    %180 = arith.mulf %173, %179 : vector<16x128xf32>
    %c12 = arith.constant 12 : index
    %c0_106 = arith.constant 0 : index
    %181 = vector.load %arg4[%c12, %c0_106] : memref<16x128xf32, #tpu.memory_space<vmem>>, vector<1x128xf32>
    %182 = vector.broadcast %181 : vector<1x128xf32> to vector<16x128xf32>
    %183 = arith.mulf %180, %182 : vector<16x128xf32>
    %c13 = arith.constant 13 : index
    %c0_107 = arith.constant 0 : index
    %184 = vector.load %arg4[%c13, %c0_107] : memref<16x128xf32, #tpu.memory_space<vmem>>, vector<1x128xf32>
    %185 = vector.broadcast %184 : vector<1x128xf32> to vector<16x128xf32>
    %186 = arith.addf %183, %185 : vector<16x128xf32>
    %c0_108 = arith.constant 0 : index
    %c0_109 = arith.constant 0 : index
    %187 = vector.load %arg8[%c0_108, %c0_109] : memref<16x128xf32, #tpu.memory_space<vmem>>, vector<16x128xf32>
    tpu.vector_store %arg8[%c0_108, %c0_109], %186 {strides = array<i32>} : memref<16x128xf32, #tpu.memory_space<vmem>>, vector<16x128xf32>,
    return
  }
  func.func @transform_0(%arg0: i32) -> (i32, i32) {
    %c0_i32 = arith.constant 0 : i32
    %c0_i32_0 = arith.constant 0 : i32
    %c0_i32_1 = arith.constant 0 : i32
    return %c0_i32, %c0_i32_0 : i32, i32
  }
  func.func @transform_1(%arg0: i32) -> (i32, i32) {
    %c0_i32 = arith.constant 0 : i32
    %c0_i32_0 = arith.constant 0 : i32
    %c0_i32_1 = arith.constant 0 : i32
    return %c0_i32, %c0_i32_0 : i32, i32
  }
  func.func @transform_2(%arg0: i32) -> (i32, i32, i32) {
    %c0_i32 = arith.constant 0 : i32
    %c0_i32_0 = arith.constant 0 : i32
    %c0_i32_1 = arith.constant 0 : i32
    %c0_i32_2 = arith.constant 0 : i32
    return %c0_i32, %c0_i32_0, %c0_i32_1 : i32, i32, i32
  }
  func.func @transform_3(%arg0: i32) -> (i32, i32) {
    %c0_i32 = arith.constant 0 : i32
    %c0_i32_0 = arith.constant 0 : i32
    %c0_i32_1 = arith.constant 0 : i32
    return %c0_i32, %c0_i32_0 : i32, i32
  }
  func.func @transform_4(%arg0: i32) -> (i32, i32, i32) {
    %c0_i32 = arith.constant 0 : i32
    %c0_i32_0 = arith.constant 0 : i32
    %c0_i32_1 = arith.constant 0 : i32
    %c0_i32_2 = arith.constant 0 : i32
    return %c0_i32, %c0_i32_0, %c0_i32_1 : i32, i32, i32
  }
  func.func @transform_5(%arg0: i32) -> (i32, i32, i32) {
    %c0_i32 = arith.constant 0 : i32
    %c0_i32_0 = arith.constant 0 : i32
    %c0_i32_1 = arith.constant 0 : i32
    %c0_i32_2 = arith.constant 0 : i32
    return %c0_i32, %c0_i32_0, %c0_i32_1 : i32, i32, i32
  }
  func.func @transform_6(%arg0: i32) -> (i32, i32, i32) {
    %c0_i32 = arith.constant 0 : i32
    %c0_i32_0 = arith.constant 0 : i32
    %c0_i32_1 = arith.constant 0 : i32
    %c0_i32_2 = arith.constant 0 : i32
    return %c0_i32, %c0_i32_0, %c0_i32_1 : i32, i32, i32
  }
  func.func @transform_7(%arg0: i32) -> (i32, i32) {
    %c0_i32 = arith.constant 0 : i32
    %c0_i32_0 = arith.constant 0 : i32
    %c0_i32_1 = arith.constant 0 : i32
    return %c0_i32, %c0_i32_0 : i32, i32
  }
}

</mosaic_0001>

<bundles_post_ra>
// kernel: decoder_layer.1
= control target key start
LH: loop header
LB: loop body
LE: loop exit
PB: predicated region body
PF: predicated region fallthrough
CT: control target
= control target key end

     0   :  { %12 = vsyncpa [#allocation3], 0  ;;  %s3433_s0 = inlined_call_operand.vmem [shape: f32[16,128], index: 0, kind: input, shape index: {}]   ;;  %s3434_s1 = inlined_call_operand.vmem [shape: f32[32,128], index: 1, kind: input, shape index: {}]   ;;  %s3435_s2 = inlined_call_operand.hbm [shape: f32[8,128,128], index: 2, kind: input, shape index: {}]   ;;  %s3436_s3 = inlined_call_operand.hbm [shape: f32[16,128], index: 3, kind: input, shape index: {}]   ;;  %s3437_s4 = inlined_call_operand.vmem [shape: f32[3,64,128], index: 4, kind: input, shape index: {}]   ;;  %s3438_s5 = inlined_call_operand.hbm [shape: f32[3,128,128], index: 5, kind: input, shape index: {}]   ;;  %s3439_s6 = inlined_call_operand.hbm [shape: f32[3,16,128], index: 6, kind: input, shape index: {}]   ;;  %s3440_s7 = inlined_call_operand.vmem [shape: f32[16,128], index: 7, kind: output, shape index: {}]  }
   0x1   :  { %13 = vsyncpa [#allocation5], 0 }
   0x2   :  { %14 = vsyncpa [#allocation8], 0  ;;  %s3065_s24 = smov [#allocation4]   ;;  %s3066_s26 = smov [#allocation2]  }
   0x3   :  { %s36_s25 = sshll.u32 %s3065_s24, 4  ;;  %s24_s27 = sshll.u32 %s3066_s26, 4  ;;  %s37_s25 = int_to_ptr.vmem [resolvable:$true] %s36_s25  ;;  %s25_s27 = int_to_ptr.vmem [resolvable:$true] %s24_s27 }
   0x4   :  { %s2987_s28 = scalar_lea.vmem %s37_s25, 256  ;;  %p2992_p1 = scmp.lt.s32.totalorder %s37_s25, %s37_s25 }
   0x5   :  { %p2988_p0 = scmp.ne.s32.totalorder %s37_s25, %s2987_s28  ;;  %p2993_p2 = scmp.lt.s32.totalorder %s2987_s28, %s2987_s28 }
   0x7   :  { %p2994_p3 = por %p2993_p2, %p2992_p1 }
   0x9   :  { %p2995_p4 = pnand %p2994_p3, %p2988_p0 }
   0xb   :  { %2998 = shalt.err (!%p2995_p4)
}
   0xc   :  { %s3067_s29 = smov 128   ;;  %s3068_s30 = smov 8  }
   0xd   :  { %42 = dma.hbm_to_vmem [thread:$0]  %s3436_s3, 256, %s37_s25, [#allocation5], %s3067_s29, %s3067_s29, %s3068_s30  }
   0xe   :  { %s3007_s10 = scalar_lea.vmem %s25_s27, 16384  ;;  %p3012_p6 = scmp.lt.s32.totalorder %s25_s27, %s25_s27 }
   0xf   :  { %p3008_p5 = scmp.ne.s32.totalorder %s25_s27, %s3007_s10  ;;  %p3013_p7 = scmp.lt.s32.totalorder %s3007_s10, %s3007_s10 }
  0x11   :  { %p3014_p8 = por %p3013_p7, %p3012_p6 }
  0x13   :  { %p3015_p9 = pnand %p3014_p8, %p3008_p5 }
  0x15   :  { %3018 = shalt.err (!%p3015_p9)
}
  0x16   :  { %30 = dma.hbm_to_vmem [thread:$0]  %s3435_s2, 16384, %s25_s27, [#allocation3], %s3067_s29, %s3067_s29, %s3068_s30  }
  0x17   :  { %s3069_s13 = smov [#allocation6]   ;;  %s3070_s15 = smov [#allocation7]  }
  0x18   :  { %s50_s14 = sshll.u32 %s3069_s13, 4  ;;  %s62_s16 = sshll.u32 %s3070_s15, 4  ;;  %s51_s14 = int_to_ptr.vmem [resolvable:$true] %s50_s14  ;;  %s63_s16 = int_to_ptr.vmem [resolvable:$true] %s62_s16 }
  0x19   :  { %s3027_s3 = scalar_lea.vmem %s51_s14, 6144  ;;  %p3032_p11 = scmp.lt.s32.totalorder %s51_s14, %s51_s14 }
  0x1a   :  { %p3028_p10 = scmp.ne.s32.totalorder %s51_s14, %s3027_s3  ;;  %p3033_p12 = scmp.lt.s32.totalorder %s3027_s3, %s3027_s3 }
  0x1c   :  { %p3034_p13 = por %p3033_p12, %p3032_p11 }
  0x1e   :  { %p3035_p0 = pnand %p3034_p13, %p3028_p10 }
  0x20   :  { %3038 = shalt.err (!%p3035_p0)
}
  0x21   :  { %56 = dma.hbm_to_vmem [thread:$0]  %s3438_s5, 6144, %s51_s14, [#allocation5], %s3067_s29, %s3067_s29, %s3068_s30  }
  0x22   :  { %s3047_s2 = scalar_lea.vmem %s63_s16, 768  ;;  %p3052_p2 = scmp.lt.s32.totalorder %s63_s16, %s63_s16 }
  0x23   :  { %p3048_p1 = scmp.ne.s32.totalorder %s63_s16, %s3047_s2  ;;  %p3053_p3 = scmp.lt.s32.totalorder %s3047_s2, %s3047_s2 }
  0x25   :  { %p3054_p4 = por %p3053_p3, %p3052_p2 }
  0x27   :  { %p3055_p5 = pnand %p3054_p4, %p3048_p1 }
  0x29   :  { %3058 = shalt.err (!%p3055_p5)
}
  0x2a   :  { %68 = dma.hbm_to_vmem [thread:$0]  %s3439_s6, 768, %s63_s16, [#allocation8], %s3067_s29, %s3067_s29, %s3068_s30  }
  0x2b   :  { %3059 = dma.done.wait [#allocation3], 16384  }
  0x2c   :  { %3060 = vsyncadd [#allocation3], 4294950912 }
  0x2d   :  { %3061 = dma.done.wait [#allocation5], 6400  }
  0x2e   :  { %3062 = vsyncadd [#allocation5], 4294960896 }
  0x2f   :  { %3063 = dma.done.wait [#allocation8], 768  }
  0x30   :  { %3064 = vsyncadd [#allocation8], 4294966528  ;;  %v201_v0 = vld [vmem:[#allocation2 + $0xf8] sm:$0xff]  ;;  %v200_v1 = vld [vmem:[#allocation2 + $0xf0] sm:$0xff]  ;;  %vm311_vm0 = vcmask 130048   ;;  %vm528_vm1 = vcmask 523264  }
  0x31   :  { %2477 = vmatprep.subr.mxu1 %v201_v0  ;;  %v199_v2 = vld [vmem:[#allocation2 + $0xe8] sm:$0xff]  ;;  %v198_v3 = vld [vmem:[#allocation2 + $0xe0] sm:$0xff]  ;;  %v197_v5 = vld [vmem:[#allocation2 + $0xd8] sm:$0xff]  ;;  %vm708_vm2 = vcmask 1043456   ;;  %vm701_vm3 = vcmask 31744   ;;  %vm1186_vm4 = vcmask 261120  }
  0x32   :  { %2478 = vmatpush3.msra.mxu1 %v201_v0  ;;  %v3138_v4 = vld [vmem:[%s3433_s0] sm:$0xff]  ;;  %v104_v6 = vld [vmem:[#allocation2 + $0x78] sm:$0xff]  ;;  %v103_v7 = vld [vmem:[#allocation2 + $0x70] sm:$0xff] }
  0x33   :  { %2479 = vmatprep.subr.mxu1 %v200_v1  ;;  %2509 = vmatprep.mubr.f32.mxu1 %v3138_v4  ;;  %v196_v8 = vld [vmem:[#allocation2 + $0xd0] sm:$0xff]  ;;  %v102_v9 = vld [vmem:[#allocation2 + $0x68] sm:$0xff]  ;;  %v101_v11 = vld [vmem:[#allocation2 + $0x60] sm:$0xff] }
  0x34   :  { %2480 = vmatpush3.msra.mxu1 %v200_v1  ;;  %2442 = vmatprep.subr.mxu0 %v104_v6  ;;  %v195_v10 = vld [vmem:[#allocation2 + $0xc8] sm:$0xff]  ;;  %v194_v12 = vld [vmem:[#allocation2 + $0xc0] sm:$0xff]  ;;  %v100_v13 = vld [vmem:[#allocation2 + $0x58] sm:$0xff] }
  0x35   :  { %2481 = vmatprep.subr.mxu1 %v199_v2  ;;  %2443 = vmatpush3.msra.mxu0 %v104_v6  ;;  %v193_v14 = vld [vmem:[#allocation2 + $0xb8] sm:$0xff]  ;;  %v99_v15 = vld [vmem:[#allocation2 + $0x50] sm:$0xff]  ;;  %v98_v17 = vld [vmem:[#allocation2 + $0x48] sm:$0xff] }
  0x36   :  { %2482 = vmatpush3.msra.mxu1 %v199_v2  ;;  %2444 = vmatprep.subr.mxu0 %v103_v7  ;;  %v192_v16 = vld [vmem:[#allocation2 + $0xb0] sm:$0xff]  ;;  %v191_v18 = vld [vmem:[#allocation2 + $0xa8] sm:$0xff]  ;;  %v97_v19 = vld [vmem:[#allocation2 + $0x40] sm:$0xff] }
  0x37   :  { %2483 = vmatprep.subr.mxu1 %v198_v3  ;;  %2445 = vmatpush3.msra.mxu0 %v103_v7  ;;  %v190_v20 = vld [vmem:[#allocation2 + $0xa0] sm:$0xff]  ;;  %v96_v21 = vld [vmem:[#allocation2 + $0x38] sm:$0xff]  ;;  %v95_v23 = vld [vmem:[#allocation2 + $0x30] sm:$0xff] }
  0x38   :  { %2484 = vmatpush3.msra.mxu1 %v198_v3  ;;  %2446 = vmatprep.subr.mxu0 %v102_v9  ;;  %v189_v22 = vld [vmem:[#allocation2 + $0x98] sm:$0xff]  ;;  %v188_v24 = vld [vmem:[#allocation2 + $0x90] sm:$0xff]  ;;  %v94_v25 = vld [vmem:[#allocation2 + $0x28] sm:$0xff] }
  0x39   :  { %2485 = vmatprep.subr.mxu1 %v197_v5  ;;  %2447 = vmatpush3.msra.mxu0 %v102_v9  ;;  %v187_v26 = vld [vmem:[#allocation2 + $0x88] sm:$0xff]  ;;  %v93_v27 = vld [vmem:[#allocation2 + $0x20] sm:$0xff]  ;;  %v92_v29 = vld [vmem:[#allocation2 + $0x18] sm:$0xff] }
  0x3a   :  { %2486 = vmatpush3.msra.mxu1 %v197_v5  ;;  %2448 = vmatprep.subr.mxu0 %v101_v11  ;;  %v186_v28 = vld [vmem:[#allocation2 + $0x80] sm:$0xff]  ;;  %v3144_v30 = vld [vmem:[%s3433_s0 + $0x8] sm:$0xff]  ;;  %v91_v31 = vld [vmem:[#allocation2 + $0x10] sm:$0xff] }
  0x3b   :  { %2487 = vmatprep.subr.mxu1 %v196_v8  ;;  %2449 = vmatpush3.msra.mxu0 %v101_v11  ;;  %v90_v32 = vld [vmem:[#allocation2 + $0x8] sm:$0xff]  ;;  %v89_v33 = vld [vmem:[#allocation2] sm:$0xff]  ;;  %v284_v42 = vld [vmem:[%s3437_s4 + $0x10] sm:$0xff] }
  0x3c   :  { %2488 = vmatpush3.msra.mxu1 %v196_v8  ;;  %2450 = vmatprep.subr.mxu0 %v100_v13  ;;  %v282_v34 = vld [vmem:[%s3437_s4] sm:$0xff]  ;;  %v283_v40 = vld [vmem:[%s3437_s4 + $0x8] sm:$0xff]  ;;  %v285_v45 = vld [vmem:[%s3437_s4 + $0x18] sm:$0xff] }
  0x3d   :  { %2489 = vmatprep.subr.mxu1 %v195_v10  ;;  %2451 = vmatpush3.msra.mxu0 %v100_v13  ;;  %v2113_v35 = vld [vmem:[#allocation4 + $0x1] ss:$0 sm:$0xff]  ;;  %v2112_v41 = vld [vmem:[#allocation4] ss:$0 sm:$0xff]  ;;  %v287_v49 = vld [vmem:[%s3437_s4 + $0x28] sm:$0xff] }
  0x3e   :  { %2490 = vmatpush3.msra.mxu1 %v195_v10  ;;  %2452 = vmatprep.subr.mxu0 %v99_v15  ;;  %v286_v47 = vld [vmem:[%s3437_s4 + $0x20] sm:$0xff]  ;;  %v288_v50 = vld [vmem:[%s3437_s4 + $0x30] sm:$0xff]  ;;  %v289_v51 = vld [vmem:[%s3437_s4 + $0x38] sm:$0xff] }
  0x3f   :  { %2491 = vmatprep.subr.mxu1 %v194_v12  ;;  %2453 = vmatpush3.msra.mxu0 %v99_v15  ;;  %v2129_v52 = vld [vmem:[%s3437_s4 + $0xb8] sm:$0xff]  ;;  %v2128_v53 = vld [vmem:[%s3437_s4 + $0xb0] sm:$0xff]  ;;  %v2127_v54 = vld [vmem:[%s3437_s4 + $0xa8] sm:$0xff] }
  0x40   :  { %2492 = vmatpush3.msra.mxu1 %v194_v12  ;;  %2454 = vmatprep.subr.mxu0 %v98_v17  ;;  %v2126_v55 = vld [vmem:[%s3437_s4 + $0xa0] sm:$0xff]  ;;  %v2125_v56 = vld [vmem:[%s3437_s4 + $0x98] sm:$0xff]  ;;  %v2124_v57 = vld [vmem:[%s3437_s4 + $0x90] sm:$0xff] }
  0x41   :  { %2493 = vmatprep.subr.mxu1 %v193_v14  ;;  %2455 = vmatpush3.msra.mxu0 %v98_v17  ;;  %v2123_v58 = vld [vmem:[%s3437_s4 + $0x88] sm:$0xff]  ;;  %v2122_v59 = vld [vmem:[%s3437_s4 + $0x80] sm:$0xff]  ;;  %v2121_v2 = vld [vmem:[%s3437_s4 + $0x78] sm:$0xff] }
  0x42   :  { %2494 = vmatpush3.msra.mxu1 %v193_v14  ;;  %2456 = vmatprep.subr.mxu0 %v97_v19  ;;  %v2120_v5 = vld [vmem:[%s3437_s4 + $0x70] sm:$0xff]  ;;  %v2119_v9 = vld [vmem:[%s3437_s4 + $0x68] sm:$0xff]  ;;  %v2118_v11 = vld [vmem:[%s3437_s4 + $0x60] sm:$0xff] }
  0x43   :  { %2495 = vmatprep.subr.mxu1 %v192_v16  ;;  %2457 = vmatpush3.msra.mxu0 %v97_v19  ;;  %v2117_v13 = vld [vmem:[%s3437_s4 + $0x58] sm:$0xff]  ;;  %v2116_v15 = vld [vmem:[%s3437_s4 + $0x50] sm:$0xff]  ;;  %v2115_v17 = vld [vmem:[%s3437_s4 + $0x48] sm:$0xff] }
  0x44   :  { %2496 = vmatpush3.msra.mxu1 %v192_v16  ;;  %2458 = vmatprep.subr.mxu0 %v96_v21  ;;  %v2114_v19 = vld [vmem:[%s3437_s4 + $0x40] sm:$0xff] }
  0x45   :  { %2497 = vmatprep.subr.mxu1 %v191_v18  ;;  %2459 = vmatpush3.msra.mxu0 %v96_v21 }
  0x46   :  { %2498 = vmatpush3.msra.mxu1 %v191_v18  ;;  %2460 = vmatprep.subr.mxu0 %v95_v23 }
  0x47   :  { %2499 = vmatprep.subr.mxu1 %v190_v20  ;;  %2461 = vmatpush3.msra.mxu0 %v95_v23  ;;  %v309_v23 = vld [vmem:[#allocation7 + $0x10] sm:$0xff] }
  0x48   :  { %2500 = vmatpush3.msra.mxu1 %v190_v20  ;;  %2462 = vmatprep.subr.mxu0 %v94_v25 }
  0x49   :  { %2501 = vmatprep.subr.mxu1 %v189_v22  ;;  %2463 = vmatpush3.msra.mxu0 %v94_v25 }
  0x4a   :  { %2502 = vmatpush3.msra.mxu1 %v189_v22  ;;  %2464 = vmatprep.subr.mxu0 %v93_v27 }
  0x4b   :  { %2503 = vmatprep.subr.mxu1 %v188_v24  ;;  %2465 = vmatpush3.msra.mxu0 %v93_v27 }
  0x4c   :  { %2504 = vmatpush3.msra.mxu1 %v188_v24  ;;  %2466 = vmatprep.subr.mxu0 %v92_v29 }
  0x4d   :  { %2505 = vmatprep.subr.mxu1 %v187_v26  ;;  %2467 = vmatpush3.msra.mxu0 %v92_v29 }
  0x4e   :  { %2506 = vmatpush3.msra.mxu1 %v187_v26  ;;  %2468 = vmatprep.subr.mxu0 %v91_v31  ;;  %v310_v26 = vld [vmem:[#allocation7 + $0x18] sm:$0xff] }
  0x4f   :  { %2507 = vmatprep.subr.mxu1 %v186_v28  ;;  %2469 = vmatpush3.msra.mxu0 %v91_v31 }
  0x50   :  { %2508 = vmatpush3.msra.mxu1 %v186_v28  ;;  %2474 = vmatprep.mubr.f32.mxu0 %v3138_v4 }
  0x51   :  { %2510 = vmatmul.mubr.f32.vlgmr.msra.gmra.mxu1 %v3144_v30  ;;  %2470 = vmatprep.subr.mxu0 %v90_v32 }
  0x52   :  { %2471 = vmatpush3.msra.mxu0 %v90_v32 }
  0x53   :  { %2472 = vmatprep.subr.mxu0 %v89_v33 }
  0x54   :  { %2473 = vmatpush3.msra.mxu0 %v89_v33 }
  0x55   :  { %2475 = vmatmul.mubr.f32.vlgmr.msra.gmra.mxu0 %v3144_v30 }
  0x56   :  { %2516 = vmatprep.mubr.msk.f32.mxu0 %vm311_vm0, %v282_v34 }
 0x111   :  { %v2511_v36 = vpop.f32.mrf.mxu1 }
 0x112   :  { %v279_v37 = vadd.f32 %v2511_v36, %v2113_v35 }
 0x113   :  { %v273_v38 = vpop.f32.mrf.mxu1 }
 0x114   :  { %v274_v39 = vadd.f32 %v2113_v35, %v273_v38  ;;  %2512 = vmatprep.subr.mxu0 %v279_v37 }
 0x115   :  { %2513 = vmatpush3.msra.mxu0 %v279_v37  ;;  %v2476_v43 = vpop.f32.mrf.mxu0 }
 0x116   :  { %2514 = vmatprep.subr.mxu0 %v274_v39  ;;  %v3160_v44 = vadd.f32 %v2476_v43, %v2112_v41 }
 0x117   :  { %2515 = vmatpush3.msra.mxu0 %v274_v39  ;;  %v176_v46 = vpop.f32.mrf.mxu0 }
 0x118   :  { %2517 = vmatmul.mubr.msk.f32.vlgmr.msra.gmra.mxu0 %vm311_vm0, %v283_v40  ;;  %v177_v48 = vadd.f32 %v2112_v41, %v176_v46  ;;  %2547 = vmatprep.subr.mxu0 %v2129_v52  ;;  %v3238_v40 = vld [vmem:[#allocation7 + $0x20] sm:$0xff]  ;;  %v805_v41 = vld [vmem:[#allocation2 + $0x178] sm:$0xff] }
 0x119   :  { %2519 = vmatprep.mubr.msk.f32.mxu0 %vm311_vm0, %v284_v42  ;;  %2548 = vmatpush3.msra.mxu0 %v2129_v52  ;;  %v800_v52 = vld [vmem:[#allocation2 + $0x150] sm:$0xff] }
 0x11a   :  { %2544 = vmatprep.mubr.f32.mxu1 %v177_v48  ;;  %2549 = vmatprep.subr.mxu0 %v2128_v53  ;;  %v804_v48 = vld [vmem:[#allocation2 + $0x170] sm:$0xff] }
 0x11b   :  { %2550 = vmatpush3.msra.mxu0 %v2128_v53  ;;  %v799_v53 = vld [vmem:[#allocation2 + $0x148] sm:$0xff] }
 0x11c   :  { %2520 = vmatmul.mubr.msk.f32.gmra.mxu0 %vm311_vm0, %v285_v45  ;;  %2551 = vmatprep.subr.mxu0 %v2127_v54 }
 0x11d   :  { %2522 = vmatprep.mubr.msk.f32.mxu0 %vm311_vm0, %v286_v47  ;;  %2552 = vmatpush3.msra.mxu0 %v2127_v54  ;;  %v798_v54 = vld [vmem:[#allocation2 + $0x140] sm:$0xff] }
 0x11e   :  { %2553 = vmatprep.subr.mxu0 %v2126_v55 }
 0x11f   :  { %2554 = vmatpush3.msra.mxu0 %v2126_v55  ;;  %v797_v55 = vld [vmem:[#allocation2 + $0x138] sm:$0xff] }
 0x120   :  { %2523 = vmatmul.mubr.msk.f32.gmra.mxu0 %vm311_vm0, %v287_v49  ;;  %2555 = vmatprep.subr.mxu0 %v2125_v56  ;;  %v803_v49 = vld [vmem:[#allocation2 + $0x168] sm:$0xff] }
 0x121   :  { %2525 = vmatprep.mubr.msk.f32.mxu0 %vm311_vm0, %v288_v50  ;;  %2556 = vmatpush3.msra.mxu0 %v2125_v56  ;;  %v802_v50 = vld [vmem:[#allocation2 + $0x160] sm:$0xff]  ;;  %v796_v56 = vld [vmem:[#allocation2 + $0x130] sm:$0xff] }
 0x122   :  { %2557 = vmatprep.subr.mxu0 %v2124_v57 }
 0x123   :  { %2558 = vmatpush3.msra.mxu0 %v2124_v57  ;;  %v795_v57 = vld [vmem:[#allocation2 + $0x128] sm:$0xff] }
 0x124   :  { %2526 = vmatmul.mubr.msk.f32.gmra.mxu0 %vm311_vm0, %v289_v51  ;;  %2559 = vmatprep.subr.mxu0 %v2123_v58  ;;  %v801_v51 = vld [vmem:[#allocation2 + $0x158] sm:$0xff] }
 0x125   :  { %2560 = vmatpush3.msra.mxu0 %v2123_v58  ;;  %v794_v58 = vld [vmem:[#allocation2 + $0x120] sm:$0xff] }
 0x126   :  { %2561 = vmatprep.subr.mxu0 %v2122_v59 }
 0x127   :  { %2562 = vmatpush3.msra.mxu0 %v2122_v59  ;;  %v793_v59 = vld [vmem:[#allocation2 + $0x118] sm:$0xff] }
 0x1d8   :  { %v2518_v60 = vpop.f32.mrf.mxu0 }
 0x1d9   :  { %v442_v18 = vmul.f32 %v2518_v60, %v2115_v17  ;;  %v792_v60 = vld [vmem:[#allocation2 + $0x110] sm:$0xff]  ;;  %v1033_v17 = vld [vmem:[#allocation2 + $0x228] sm:$0xff] }
 0x1da   :  { %v402_v61 = vpop.f32.mrf.mxu0 }
 0x1db   :  { %v441_v20 = vmul.f32 %v2114_v19, %v402_v61  ;;  %v791_v61 = vld [vmem:[#allocation2 + $0x108] sm:$0xff]  ;;  %v1031_v19 = vld [vmem:[#allocation2 + $0x218] sm:$0xff] }
 0x1dc   :  { %v2521_v62 = vpop.f32.mrf.mxu0 }
 0x1dd   :  { %v444_v14 = vmul.f32 %v2521_v62, %v2117_v13  ;;  %v790_v62 = vld [vmem:[#allocation2 + $0x100] sm:$0xff]  ;;  %v1037_v13 = vld [vmem:[#allocation2 + $0x248] sm:$0xff] }
 0x1de   :  { %v412_v63 = vpop.f32.mrf.mxu0 }
 0x1df   :  { %v443_v16 = vmul.f32 %v2116_v15, %v412_v63  ;;  %v1043_v63 = vld [vmem:[#allocation2 + $0x278] sm:$0xff] }
 0x1e0   :  { %v2524_v0 = vpop.f32.mrf.mxu0  ;;  %v1035_v15 = vld [vmem:[#allocation2 + $0x238] sm:$0xff] }
 0x1e1   :  { %v446_v10 = vmul.f32 %v2524_v0, %v2119_v9  ;;  %v1041_v9 = vld [vmem:[#allocation2 + $0x268] sm:$0xff] }
 0x1e2   :  { %v422_v1 = vpop.f32.mrf.mxu0 }
 0x1e3   :  { %v445_v12 = vmul.f32 %v2118_v11, %v422_v1  ;;  %v1039_v11 = vld [vmem:[#allocation2 + $0x258] sm:$0xff] }
 0x1e4   :  { %v2527_v3 = vpop.f32.mrf.mxu0 }
 0x1e5   :  { %v448_v6 = vmul.f32 %v2527_v3, %v2121_v2 }
 0x1e6   :  { %v432_v7 = vpop.f32.mrf.mxu0 }
 0x1e7   :  { %v447_v8 = vmul.f32 %v2120_v5, %v432_v7  ;;  %2528 = vmatprep.subr.mxu1 %v448_v6  ;;  %2566 = vmatprep.subr.mxu0 %v448_v6  ;;  %v85_v7 = vld [vmem:[%s3434_s1] sm:$0xff] }
 0x1e8   :  { %2529 = vmatpush3.xpose.msra.mxu1 %v448_v6 }
 0x1e9   :  { %2530 = vmatprep.subr.mxu1 %v447_v8 }
 0x1ec   :  { %2531 = vmatpush3.xpose.msra.mxu1 %v447_v8 }
 0x1ed   :  { %2532 = vmatprep.subr.mxu1 %v446_v10 }
 0x1f0   :  { %2533 = vmatpush3.xpose.msra.mxu1 %v446_v10 }
 0x1f1   :  { %2534 = vmatprep.subr.mxu1 %v445_v12 }
 0x1f4   :  { %2535 = vmatpush3.xpose.msra.mxu1 %v445_v12 }
 0x1f5   :  { %2536 = vmatprep.subr.mxu1 %v444_v14 }
 0x1f8   :  { %2537 = vmatpush3.xpose.msra.mxu1 %v444_v14 }
 0x1f9   :  { %2538 = vmatprep.subr.mxu1 %v443_v16 }
 0x1fc   :  { %2539 = vmatpush3.xpose.msra.mxu1 %v443_v16 }
 0x1fd   :  { %2540 = vmatprep.subr.mxu1 %v442_v18 }
 0x200   :  { %2541 = vmatpush3.xpose.msra.mxu1 %v442_v18 }
 0x201   :  { %2542 = vmatprep.subr.mxu1 %v441_v20 }
 0x204   :  { %2543 = vmatpush3.xpose.msra.mxu1 %v441_v20 }
 0x207   :  { %2545 = vmatmul.mubr.f32.vlgmr.msra.gmra.mxu1 %v3160_v44 }
 0x2c7   :  { %v2546_v21 = vpop.f32.mrf.mxu1 }
 0x2c8   :  { %v525_v24 = vmul.f32 0.35355338, %v2546_v21  ;;  %v1029_v21 = vld [vmem:[#allocation2 + $0x208] sm:$0xff] }
 0x2c9   :  { %v515_v22 = vpop.f32.mrf.mxu1 }
 0x2ca   :  { %v524_v25 = vmul.f32 0.35355338, %v515_v22  ;;  %v527_v29 = vadd.f32 %v525_v24, %v310_v26  ;;  %v1028_v22 = vld [vmem:[#allocation2 + $0x200] sm:$0xff]  ;;  %v87_v24 = vld [vmem:[%s3434_s1 + $0x10] sm:$0xff] }
 0x2cc   :  { %v526_v27 = vadd.f32 %v524_v25, %v309_v23  ;;  %v532_v31 = vsel %vm528_vm1, %v527_v29, -inf  ;;  %v86_v23 = vld [vmem:[%s3434_s1 + $0x8] sm:$0xff]  ;;  %v88_v25 = vld [vmem:[%s3434_s1 + $0x18] sm:$0xff] }
 0x2ce   :  { %v529_v28 = vsel %vm528_vm1, %v526_v27, -inf }
 0x2cf   :  { %530 = vmax.xlane.f32.xlu0 %v529_v28 }
 0x2d3   :  { %533 = vmax.xlane.f32.xlu0 %v532_v31 }
 0x358   :  { %v531_v32 = vpop.xlane.xlu0 %530 }
 0x359   :  { %v535_v33 = vsub.f32 %v526_v27, %v531_v32  ;;  %v2145_v27 = vld [vmem:[#allocation4 + $0x2] ss:$0 sm:$0xff] }
 0x35b   :  { %v537_v34 = vmul.f32 1.442695, %v535_v33 }
 0x35c   :  { %v534_v35 = vpop.xlane.xlu0 %533 }
 0x35d   :  { %2951 = vpow2.f32 %v537_v34  ;;  %v536_v36 = vsub.f32 %v527_v29, %v534_v35 }
 0x35f   :  { %v539_v37 = vmul.f32 1.442695, %v536_v36  ;;  %v945_v36 = vld [vmem:[#allocation2 + $0x1f0] sm:$0xff] }
 0x361   :  { %2953 = vpow2.f32 %v539_v37  ;;  %v943_v37 = vld [vmem:[#allocation2 + $0x1e0] sm:$0xff] }
 0x36a   :  { %v2952_v38 = vpop.eup %2951 }
 0x36b   :  { %2563 = vmatprep.mubr.msk.f32.mxu0 %vm528_vm1, %v2952_v38 }
 0x36e   :  { %v2954_v39 = vpop.eup %2953 }
 0x36f   :  { %2564 = vmatmul.mubr.msk.f32.vlgmr.msra.gmra.mxu0 %vm528_vm1, %v2954_v39 }
 0x370   :  { %2567 = vmatpush3.msra.mxu0 %v448_v6  ;;  %2582 = vmatprep.mubr.msk.f32.mxu0 %vm528_vm1, %v2952_v38  ;;  %v942_v38 = vld [vmem:[#allocation2 + $0x1d8] sm:$0xff] }
 0x371   :  { %2568 = vmatprep.subr.mxu0 %v447_v8 }
 0x372   :  { %2569 = vmatpush3.msra.mxu0 %v447_v8  ;;  %v1042_v8 = vld [vmem:[#allocation2 + $0x270] sm:$0xff] }
 0x373   :  { %2570 = vmatprep.subr.mxu0 %v446_v10 }
 0x374   :  { %2571 = vmatpush3.msra.mxu0 %v446_v10  ;;  %v1040_v10 = vld [vmem:[#allocation2 + $0x260] sm:$0xff] }
 0x375   :  { %2572 = vmatprep.subr.mxu0 %v445_v12 }
 0x376   :  { %2573 = vmatpush3.msra.mxu0 %v445_v12  ;;  %v1038_v12 = vld [vmem:[#allocation2 + $0x250] sm:$0xff] }
 0x377   :  { %2574 = vmatprep.subr.mxu0 %v444_v14 }
 0x378   :  { %2575 = vmatpush3.msra.mxu0 %v444_v14  ;;  %v1036_v14 = vld [vmem:[#allocation2 + $0x240] sm:$0xff] }
 0x379   :  { %2576 = vmatprep.subr.mxu0 %v443_v16 }
 0x37a   :  { %2577 = vmatpush3.msra.mxu0 %v443_v16  ;;  %v1034_v16 = vld [vmem:[#allocation2 + $0x230] sm:$0xff] }
 0x37b   :  { %2578 = vmatprep.subr.mxu0 %v442_v18 }
 0x37c   :  { %2579 = vmatpush3.msra.mxu0 %v442_v18  ;;  %v1032_v18 = vld [vmem:[#allocation2 + $0x220] sm:$0xff] }
 0x37d   :  { %2580 = vmatprep.subr.mxu0 %v441_v20 }
 0x37e   :  { %2581 = vmatpush3.msra.mxu0 %v441_v20  ;;  %v1030_v20 = vld [vmem:[#allocation2 + $0x210] sm:$0xff] }
 0x37f   :  { %2583 = vmatmul.mubr.msk.f32.vlgmr.msra.gmra.mxu0 %vm528_vm1, %v2954_v39  ;;  %2585 = vmatprep.subr.msk.mxu0 %vm708_vm2, %v3238_v40  ;;  %v941_v39 = vld [vmem:[#allocation2 + $0x1d0] sm:$0xff] }
 0x380   :  { %2586 = vmatpush3.msk.msra.mxu0 %vm708_vm2, %v3238_v40 }
 0x381   :  { %2590 = vmatprep.subr.mxu0 %v805_v41 }
 0x42f   :  { %v2565_v42 = vpop.f32.mrf.mxu0 }
 0x430   :  { %v623_v43 = vmax.f32 %v2565_v42, 1e-30  ;;  %v939_v42 = vld [vmem:[#allocation2 + $0x1c0] sm:$0xff] }
 0x431   :  { %v613_v44 = vpop.f32.mrf.mxu0 }
 0x432   :  { %v622_v45 = vmax.f32 %v613_v44, 1e-30  ;;  %v3270_v44 = vld [vmem:[#allocation4 + $0x4] ss:$0 sm:$0xff] }
 0x434   :  { %2955 = vrcp.f32 %v622_v45  ;;  %v937_v45 = vld [vmem:[#allocation2 + $0x1b0] sm:$0xff] }
 0x435   :  { %2957 = vrcp.f32 %v623_v43  ;;  %v938_v43 = vld [vmem:[#allocation2 + $0x1b8] sm:$0xff] }
 0x43f   :  { %v2584_v0 = vpop.f32.mrf.mxu0 }
 0x441   :  { %v2956_v46 = vpop.eup %2955  ;;  %v692_v1 = vpop.f32.mrf.mxu0 }
 0x442   :  { %v2958_v47 = vpop.eup %2957  ;;  %2587 = vmatprep.mubr.msk.f32.mxu0 %vm701_vm3, %v2956_v46 }
 0x443   :  { %2588 = vmatmul.mubr.msk.f32.vlgmr.msra.gmra.mxu0 %vm701_vm3, %v2958_v47 }
 0x444   :  { %2591 = vmatpush3.msra.mxu0 %v805_v41  ;;  %v940_v41 = vld [vmem:[#allocation2 + $0x1c8] sm:$0xff] }
 0x445   :  { %2592 = vmatprep.subr.mxu0 %v804_v48 }
 0x446   :  { %2593 = vmatpush3.msra.mxu0 %v804_v48  ;;  %v936_v48 = vld [vmem:[#allocation2 + $0x1a8] sm:$0xff] }
 0x447   :  { %2594 = vmatprep.subr.mxu0 %v803_v49 }
 0x448   :  { %2595 = vmatpush3.msra.mxu0 %v803_v49 }
 0x449   :  { %2596 = vmatprep.subr.mxu0 %v802_v50 }
 0x44a   :  { %2597 = vmatpush3.msra.mxu0 %v802_v50 }
 0x44b   :  { %2598 = vmatprep.subr.mxu0 %v801_v51 }
 0x44c   :  { %2599 = vmatpush3.msra.mxu0 %v801_v51  ;;  %v935_v51 = vld [vmem:[#allocation2 + $0x1a0] sm:$0xff] }
 0x44d   :  { %2600 = vmatprep.subr.mxu0 %v800_v52 }
 0x44e   :  { %2601 = vmatpush3.msra.mxu0 %v800_v52  ;;  %v934_v52 = vld [vmem:[#allocation2 + $0x198] sm:$0xff] }
 0x44f   :  { %2602 = vmatprep.subr.mxu0 %v799_v53 }
 0x450   :  { %2603 = vmatpush3.msra.mxu0 %v799_v53  ;;  %v933_v53 = vld [vmem:[#allocation2 + $0x190] sm:$0xff] }
 0x451   :  { %2604 = vmatprep.subr.mxu0 %v798_v54 }
 0x452   :  { %2605 = vmatpush3.msra.mxu0 %v798_v54  ;;  %v932_v54 = vld [vmem:[#allocation2 + $0x188] sm:$0xff] }
 0x453   :  { %2606 = vmatprep.subr.mxu0 %v797_v55 }
 0x454   :  { %2607 = vmatpush3.msra.mxu0 %v797_v55 }
 0x455   :  { %2608 = vmatprep.subr.mxu0 %v796_v56 }
 0x456   :  { %2609 = vmatpush3.msra.mxu0 %v796_v56  ;;  %v931_v56 = vld [vmem:[#allocation2 + $0x180] sm:$0xff] }
 0x457   :  { %2610 = vmatprep.subr.mxu0 %v795_v57 }
 0x458   :  { %2611 = vmatpush3.msra.mxu0 %v795_v57 }
 0x459   :  { %2612 = vmatprep.subr.mxu0 %v794_v58 }
 0x45a   :  { %2613 = vmatpush3.msra.mxu0 %v794_v58 }
 0x45b   :  { %2614 = vmatprep.subr.mxu0 %v793_v59 }
 0x45c   :  { %2615 = vmatpush3.msra.mxu0 %v793_v59 }
 0x45d   :  { %2616 = vmatprep.subr.mxu0 %v792_v60 }
 0x45e   :  { %2617 = vmatpush3.msra.mxu0 %v792_v60 }
 0x45f   :  { %2618 = vmatprep.subr.mxu0 %v791_v61 }
 0x460   :  { %2619 = vmatpush3.msra.mxu0 %v791_v61 }
 0x461   :  { %2620 = vmatprep.subr.mxu0 %v790_v62 }
 0x462   :  { %2621 = vmatpush3.msra.mxu0 %v790_v62 }
 0x463   :  { %2660 = vmatprep.subr.mxu0 %v1043_v63 }
 0x503   :  { %v2589_v2 = vpop.f32.mrf.mxu0 }
 0x504   :  { %v788_v6 = vmul.f32 %v2589_v2, %v2584_v0 }
 0x505   :  { %v778_v3 = vpop.f32.mrf.mxu0 }
 0x506   :  { %v787_v5 = vmul.f32 %v778_v3, %v692_v1 }
 0x508   :  { %2622 = vmatprep.mubr.f32.mxu0 %v787_v5 }
 0x509   :  { %2623 = vmatmul.mubr.f32.vlgmr.msra.gmra.mxu0 %v788_v6 }
 0x50a   :  { %2661 = vmatpush3.msra.mxu0 %v1043_v63  ;;  %2692 = vmatprep.mubr.f32.mxu0 %v85_v7 }
 0x50b   :  { %2662 = vmatprep.subr.mxu0 %v1042_v8 }
 0x50c   :  { %2663 = vmatpush3.msra.mxu0 %v1042_v8 }
 0x50d   :  { %2664 = vmatprep.subr.mxu0 %v1041_v9 }
 0x50e   :  { %2665 = vmatpush3.msra.mxu0 %v1041_v9 }
 0x50f   :  { %2666 = vmatprep.subr.mxu0 %v1040_v10 }
 0x510   :  { %2667 = vmatpush3.msra.mxu0 %v1040_v10 }
 0x511   :  { %2668 = vmatprep.subr.mxu0 %v1039_v11 }
 0x512   :  { %2669 = vmatpush3.msra.mxu0 %v1039_v11  ;;  %v2146_v11 = vld [vmem:[#allocation4 + $0x8] ss:$0 sm:$0xff] }
 0x513   :  { %2670 = vmatprep.subr.mxu0 %v1038_v12 }
 0x514   :  { %2671 = vmatpush3.msra.mxu0 %v1038_v12 }
 0x515   :  { %2672 = vmatprep.subr.mxu0 %v1037_v13 }
 0x516   :  { %2673 = vmatpush3.msra.mxu0 %v1037_v13 }
 0x517   :  { %2674 = vmatprep.subr.mxu0 %v1036_v14 }
 0x518   :  { %2675 = vmatpush3.msra.mxu0 %v1036_v14 }
 0x519   :  { %2676 = vmatprep.subr.mxu0 %v1035_v15 }
 0x51a   :  { %2677 = vmatpush3.msra.mxu0 %v1035_v15  ;;  %v2147_v15 = vld [vmem:[#allocation4 + $0x9] ss:$0 sm:$0xff] }
 0x51b   :  { %2678 = vmatprep.subr.mxu0 %v1034_v16 }
 0x51c   :  { %2679 = vmatpush3.msra.mxu0 %v1034_v16 }
 0x51d   :  { %2680 = vmatprep.subr.mxu0 %v1033_v17 }
 0x51e   :  { %2681 = vmatpush3.msra.mxu0 %v1033_v17 }
 0x51f   :  { %2682 = vmatprep.subr.mxu0 %v1032_v18 }
 0x520   :  { %2683 = vmatpush3.msra.mxu0 %v1032_v18 }
 0x521   :  { %2684 = vmatprep.subr.mxu0 %v1031_v19 }
 0x522   :  { %2685 = vmatpush3.msra.mxu0 %v1031_v19 }
 0x523   :  { %2686 = vmatprep.subr.mxu0 %v1030_v20 }
 0x524   :  { %2687 = vmatpush3.msra.mxu0 %v1030_v20 }
 0x525   :  { %2688 = vmatprep.subr.mxu0 %v1029_v21 }
 0x526   :  { %2689 = vmatpush3.msra.mxu0 %v1029_v21 }
 0x527   :  { %2690 = vmatprep.subr.mxu0 %v1028_v22 }
 0x528   :  { %2691 = vmatpush3.msra.mxu0 %v1028_v22  ;;  %v1134_v22 = vld [vmem:[#allocation6] sm:$0xff] }
 0x529   :  { %2693 = vmatmul.mubr.f32.vlgmr.msra.gmra.mxu0 %v86_v23 }
 0x52a   :  { %2695 = vmatprep.mubr.f32.mxu0 %v87_v24  ;;  %v1135_v24 = vld [vmem:[#allocation6 + $0x8] sm:$0xff] }
 0x52d   :  { %2696 = vmatmul.mubr.f32.gmra.mxu0 %v88_v25  ;;  %v1136_v25 = vld [vmem:[#allocation6 + $0x10] sm:$0xff] }
 0x5c9   :  { %v2624_v26 = vpop.f32.mrf.mxu0 }
 0x5ca   :  { %v882_v28 = vadd.f32 %v2624_v26, %v3144_v30  ;;  %v946_v30 = vld [vmem:[#allocation2 + $0x1f8] sm:$0xff]  ;;  %v1137_v26 = vld [vmem:[#allocation6 + $0x18] sm:$0xff] }
 0x5cb   :  { %v872_v29 = vpop.f32.mrf.mxu0  ;;  %2625 = vmatprep.subr.mxu1 %v946_v30 }
 0x5cc   :  { %v3259_v31 = vadd.f32 %v2145_v27, %v882_v28  ;;  %v881_v32 = vadd.f32 %v872_v29, %v3138_v4  ;;  %2626 = vmatpush3.msra.mxu1 %v946_v30  ;;  %v944_v4 = vld [vmem:[#allocation2 + $0x1e8] sm:$0xff]  ;;  %v1139_v28 = vld [vmem:[#allocation6 + $0x28] sm:$0xff]  ;;  %v1140_v29 = vld [vmem:[#allocation6 + $0x30] sm:$0xff] }
 0x5cd   :  { %2627 = vmatprep.subr.mxu1 %v945_v36  ;;  %v1146_v30 = vld [vmem:[#allocation6 + $0x60] sm:$0xff] }
 0x5ce   :  { %v3262_v33 = vadd.f32 %v2145_v27, %v881_v32  ;;  %892 = vadd.xlane.f32.xlu1 %v3259_v31  ;;  %v897_v35 = vmul.f32 %v3259_v31, %v3259_v31  ;;  %2628 = vmatpush3.msra.mxu1 %v945_v36  ;;  %v1138_v27 = vld [vmem:[#allocation6 + $0x20] sm:$0xff]  ;;  %v1147_v36 = vld [vmem:[#allocation6 + $0x68] sm:$0xff] }
 0x5cf   :  { %2629 = vmatprep.subr.mxu1 %v944_v4  ;;  %v1142_v32 = vld [vmem:[#allocation6 + $0x40] sm:$0xff] }
 0x5d0   :  { %v896_v34 = vmul.f32 %v3262_v33, %v3262_v33  ;;  %2630 = vmatpush3.msra.mxu1 %v944_v4  ;;  %v1148_v4 = vld [vmem:[#allocation6 + $0x70] sm:$0xff] }
 0x5d1   :  { %2631 = vmatprep.subr.mxu1 %v943_v37 }
 0x5d2   :  { %890 = vadd.xlane.f32.xlu1 %v3262_v33  ;;  %898 = vadd.xlane.f32.xlu0 %v896_v34  ;;  %v1144_v34 = vld [vmem:[#allocation6 + $0x50] sm:$0xff] }
 0x5d3   :  { %2632 = vmatpush3.msra.mxu1 %v943_v37  ;;  %v1149_v37 = vld [vmem:[#allocation6 + $0x78] sm:$0xff] }
 0x5d4   :  { %2633 = vmatprep.subr.mxu1 %v942_v38 }
 0x5d5   :  { %2634 = vmatpush3.msra.mxu1 %v942_v38  ;;  %v1183_v38 = vld [vmem:[#allocation6 + $0x178] sm:$0xff] }
 0x5d6   :  { %900 = vadd.xlane.f32.xlu1 %v897_v35  ;;  %2635 = vmatprep.subr.mxu1 %v941_v39  ;;  %v1145_v35 = vld [vmem:[#allocation6 + $0x58] sm:$0xff] }
 0x5d7   :  { %2636 = vmatpush3.msra.mxu1 %v941_v39  ;;  %2765 = vmatprep.subr.mxu0 %v1183_v38  ;;  %v1182_v39 = vld [vmem:[#allocation6 + $0x170] sm:$0xff] }
 0x5d8   :  { %2637 = vmatprep.subr.mxu1 %v940_v41  ;;  %2766 = vmatpush3.msra.mxu0 %v1183_v38  ;;  %v1154_v38 = vld [vmem:[#allocation6 + $0x98] sm:$0xff] }
 0x5d9   :  { %2638 = vmatpush3.msra.mxu1 %v940_v41  ;;  %2767 = vmatprep.subr.mxu0 %v1182_v39  ;;  %v1181_v41 = vld [vmem:[#allocation6 + $0x168] sm:$0xff] }
 0x5da   :  { %2639 = vmatprep.subr.mxu1 %v939_v42  ;;  %2768 = vmatpush3.msra.mxu0 %v1182_v39 }
 0x5db   :  { %2640 = vmatpush3.msra.mxu1 %v939_v42  ;;  %2769 = vmatprep.subr.mxu0 %v1181_v41  ;;  %v1180_v42 = vld [vmem:[#allocation6 + $0x160] sm:$0xff] }
 0x5dc   :  { %2641 = vmatprep.subr.mxu1 %v938_v43  ;;  %2770 = vmatpush3.msra.mxu0 %v1181_v41  ;;  %v1153_v41 = vld [vmem:[#allocation6 + $0x90] sm:$0xff] }
 0x5dd   :  { %2642 = vmatpush3.msra.mxu1 %v938_v43  ;;  %2771 = vmatprep.subr.mxu0 %v1180_v42  ;;  %v1179_v43 = vld [vmem:[#allocation6 + $0x158] sm:$0xff] }
 0x5de   :  { %2643 = vmatprep.subr.mxu1 %v937_v45  ;;  %2772 = vmatpush3.msra.mxu0 %v1180_v42 }
 0x5df   :  { %2644 = vmatpush3.msra.mxu1 %v937_v45  ;;  %2773 = vmatprep.subr.mxu0 %v1179_v43  ;;  %v1177_v45 = vld [vmem:[#allocation6 + $0x148] sm:$0xff] }
 0x5e0   :  { %2645 = vmatprep.subr.mxu1 %v936_v48  ;;  %2774 = vmatpush3.msra.mxu0 %v1179_v43  ;;  %v1152_v43 = vld [vmem:[#allocation6 + $0x88] sm:$0xff] }
 0x5e1   :  { %2646 = vmatpush3.msra.mxu1 %v936_v48  ;;  %v1174_v48 = vld [vmem:[#allocation6 + $0x130] sm:$0xff] }
 0x5e2   :  { %2647 = vmatprep.subr.mxu1 %v935_v51 }
 0x5e3   :  { %2648 = vmatpush3.msra.mxu1 %v935_v51  ;;  %v1171_v51 = vld [vmem:[#allocation6 + $0x118] sm:$0xff] }
 0x5e4   :  { %2649 = vmatprep.subr.mxu1 %v934_v52 }
 0x5e5   :  { %2650 = vmatpush3.msra.mxu1 %v934_v52  ;;  %v1170_v52 = vld [vmem:[#allocation6 + $0x110] sm:$0xff] }
 0x5e6   :  { %2651 = vmatprep.subr.mxu1 %v933_v53 }
 0x5e7   :  { %2652 = vmatpush3.msra.mxu1 %v933_v53  ;;  %v1169_v53 = vld [vmem:[#allocation6 + $0x108] sm:$0xff] }
 0x5e8   :  { %2653 = vmatprep.subr.mxu1 %v932_v54 }
 0x5e9   :  { %v2694_v46 = vpop.f32.mrf.mxu0  ;;  %2654 = vmatpush3.msra.mxu1 %v932_v54  ;;  %v1168_v54 = vld [vmem:[#allocation6 + $0x100] sm:$0xff] }
 0x5ea   :  { %v3273_v47 = vadd.f32 %v2694_v46, %v3270_v44  ;;  %2655 = vmatprep.subr.mxu1 %v931_v56  ;;  %v1176_v46 = vld [vmem:[#allocation6 + $0x140] sm:$0xff] }
 0x5eb   :  { %v1115_v49 = vpop.f32.mrf.mxu0  ;;  %2656 = vmatpush3.msra.mxu1 %v931_v56 }
 0x5ec   :  { %v3276_v50 = vadd.f32 %v3270_v44, %v1115_v49  ;;  %v1173_v49 = vld [vmem:[#allocation6 + $0x128] sm:$0xff] }
 0x5ed   :  { %v2697_v55 = vpop.f32.mrf.mxu0 }
 0x5ee   :  { %v1131_v57 = vadd.f32 %v2697_v55, %v3270_v44  ;;  %v2148_v55 = vld [vmem:[#allocation4 + $0x3] ss:$0 sm:$0xff] }
 0x5ef   :  { %v1125_v20 = vpop.f32.mrf.mxu0 }
 0x5f0   :  { %2698 = vmatprep.subr.mxu1 %v1131_v57  ;;  %v1126_v23 = vadd.f32 %v3270_v44, %v1125_v20  ;;  %v1178_v44 = vld [vmem:[#allocation6 + $0x150] sm:$0xff]  ;;  %v1163_v20 = vld [vmem:[#allocation6 + $0xe0] sm:$0xff] }
 0x5f1   :  { %2775 = vmatprep.subr.mxu0 %v1178_v44 }
 0x5f2   :  { %2776 = vmatpush3.msra.mxu0 %v1178_v44 }
 0x5f3   :  { %2777 = vmatprep.subr.mxu0 %v1177_v45 }
 0x5f4   :  { %2778 = vmatpush3.msra.mxu0 %v1177_v45  ;;  %v1151_v45 = vld [vmem:[#allocation6 + $0x80] sm:$0xff] }
 0x5f5   :  { %2779 = vmatprep.subr.mxu0 %v1176_v46 }
 0x5f6   :  { %2780 = vmatpush3.msra.mxu0 %v1176_v46 }
 0x657   :  { %v893_v58 = vpop.xlane.xlu1 %892 }
 0x658   :  { %v895_v61 = vmul.f32 0.03125, %v893_v58 }
 0x65a   :  { %v907_v2 = vmul.f32 %v895_v61, %v895_v61  ;;  %v905_v12 = vsub.f32 %v3259_v31, %v895_v61  ;;  %v1141_v31 = vld [vmem:[#allocation6 + $0x38] sm:$0xff] }
 0x65b   :  { %v891_v59 = vpop.xlane.xlu1 %890  ;;  %v899_v60 = vpop.xlane.xlu0 %898 }
 0x65c   :  { %v894_v62 = vmul.f32 0.03125, %v891_v59  ;;  %v902_v0 = vmul.f32 0.03125, %v899_v60 }
 0x65e   :  { %v906_v63 = vmul.f32 %v894_v62, %v894_v62  ;;  %v904_v9 = vsub.f32 %v3262_v33, %v894_v62  ;;  %v1143_v33 = vld [vmem:[#allocation6 + $0x48] sm:$0xff] }
 0x65f   :  { %v901_v1 = vpop.xlane.xlu1 %900 }
 0x660   :  { %v908_v3 = vsub.f32 %v902_v0, %v906_v63  ;;  %v903_v5 = vmul.f32 0.03125, %v901_v1 }
 0x662   :  { %v910_v6 = vadd.f32 1e-05, %v908_v3  ;;  %v909_v7 = vsub.f32 %v903_v5, %v907_v2 }
 0x664   :  { %2959 = vrsqrt.f32 %v910_v6  ;;  %v911_v8 = vadd.f32 1e-05, %v909_v7 }
 0x666   :  { %2961 = vrsqrt.f32 %v911_v8 }
 0x671   :  { %v2960_v10 = vpop.eup %2959 }
 0x672   :  { %v914_v13 = vmul.f32 %v2960_v10, %v904_v9 }
 0x673   :  { %v2962_v14 = vpop.eup %2961 }
 0x674   :  { %v915_v16 = vmul.f32 %v2962_v14, %v905_v12  ;;  %v921_v17 = vmul.f32 %v2146_v11, %v914_v13  ;;  %v1165_v13 = vld [vmem:[#allocation6 + $0xf0] sm:$0xff] }
 0x676   :  { %v922_v18 = vmul.f32 %v2146_v11, %v915_v16  ;;  %v3281_v19 = vadd.f32 %v2147_v15, %v921_v17  ;;  %v1166_v11 = vld [vmem:[#allocation6 + $0xf8] sm:$0xff]  ;;  %v1164_v17 = vld [vmem:[#allocation6 + $0xe8] sm:$0xff] }
 0x678   :  { %v3283_v21 = vadd.f32 %v2147_v15, %v922_v18  ;;  %2657 = vmatprep.mubr.f32.mxu1 %v3281_v19 }
 0x67a   :  { %2658 = vmatmul.mubr.f32.vlgmr.msra.gmra.mxu1 %v3283_v21 }
 0x67b   :  { %2699 = vmatpush3.msra.mxu1 %v1131_v57  ;;  %2706 = vmatprep.mubr.msk.f32.mxu1 %vm1186_vm4, %v1134_v22 }
 0x67c   :  { %2700 = vmatprep.subr.mxu1 %v1126_v23 }
 0x67d   :  { %2701 = vmatpush3.msra.mxu1 %v1126_v23  ;;  %v1162_v23 = vld [vmem:[#allocation6 + $0xd8] sm:$0xff] }
 0x67e   :  { %2702 = vmatprep.subr.mxu1 %v3273_v47 }
 0x67f   :  { %2703 = vmatpush3.msra.mxu1 %v3273_v47  ;;  %v1175_v47 = vld [vmem:[#allocation6 + $0x138] sm:$0xff] }
 0x680   :  { %2704 = vmatprep.subr.mxu1 %v3276_v50  ;;  %2781 = vmatprep.subr.mxu0 %v1175_v47 }
 0x681   :  { %2705 = vmatpush3.msra.mxu1 %v3276_v50  ;;  %2782 = vmatpush3.msra.mxu0 %v1175_v47  ;;  %v1172_v50 = vld [vmem:[#allocation6 + $0x120] sm:$0xff] }
 0x682   :  { %2707 = vmatmul.mubr.msk.f32.vlgmr.msra.gmra.mxu1 %vm1186_vm4, %v1135_v24  ;;  %2783 = vmatprep.subr.mxu0 %v1174_v48 }
 0x683   :  { %2709 = vmatprep.mubr.msk.f32.mxu1 %vm1186_vm4, %v1136_v25  ;;  %2784 = vmatpush3.msra.mxu0 %v1174_v48  ;;  %v1161_v25 = vld [vmem:[#allocation6 + $0xd0] sm:$0xff]  ;;  %v1185_v48 = vld [vmem:[#allocation7 + $0x8] sm:$0xff] }
 0x684   :  { %2785 = vmatprep.subr.mxu0 %v1173_v49 }
 0x685   :  { %2786 = vmatpush3.msra.mxu0 %v1173_v49 }
 0x686   :  { %2710 = vmatmul.mubr.msk.f32.gmra.mxu1 %vm1186_vm4, %v1137_v26  ;;  %2787 = vmatprep.subr.mxu0 %v1172_v50 }
 0x687   :  { %2712 = vmatprep.mubr.msk.f32.mxu1 %vm1186_vm4, %v1138_v27  ;;  %2788 = vmatpush3.msra.mxu0 %v1172_v50  ;;  %v1160_v27 = vld [vmem:[#allocation6 + $0xc8] sm:$0xff] }
 0x688   :  { %2789 = vmatprep.subr.mxu0 %v1171_v51 }
 0x689   :  { %2790 = vmatpush3.msra.mxu0 %v1171_v51  ;;  %v1184_v51 = vld [vmem:[#allocation7] sm:$0xff] }
 0x68a   :  { %2713 = vmatmul.mubr.msk.f32.gmra.mxu1 %vm1186_vm4, %v1139_v28  ;;  %2791 = vmatprep.subr.mxu0 %v1170_v52 }
 0x68b   :  { %2715 = vmatprep.mubr.msk.f32.mxu1 %vm1186_vm4, %v1140_v29  ;;  %2792 = vmatpush3.msra.mxu0 %v1170_v52  ;;  %v1159_v29 = vld [vmem:[#allocation6 + $0xc0] sm:$0xff] }
 0x68c   :  { %2793 = vmatprep.subr.mxu0 %v1169_v53 }
 0x68d   :  { %2794 = vmatpush3.msra.mxu0 %v1169_v53 }
 0x68e   :  { %2716 = vmatmul.mubr.msk.f32.gmra.mxu1 %vm1186_vm4, %v1141_v31  ;;  %2795 = vmatprep.subr.mxu0 %v1168_v54 }
 0x68f   :  { %2718 = vmatprep.mubr.msk.f32.mxu1 %vm1186_vm4, %v1142_v32  ;;  %2796 = vmatpush3.msra.mxu0 %v1168_v54  ;;  %v1158_v32 = vld [vmem:[#allocation6 + $0xb8] sm:$0xff] }
 0x692   :  { %2719 = vmatmul.mubr.msk.f32.gmra.mxu1 %vm1186_vm4, %v1143_v33 }
 0x693   :  { %2721 = vmatprep.mubr.msk.f32.mxu1 %vm1186_vm4, %v1144_v34  ;;  %v1157_v34 = vld [vmem:[#allocation6 + $0xb0] sm:$0xff] }
 0x696   :  { %2722 = vmatmul.mubr.msk.f32.gmra.mxu1 %vm1186_vm4, %v1145_v35 }
 0x697   :  { %2724 = vmatprep.mubr.msk.f32.mxu1 %vm1186_vm4, %v1146_v30  ;;  %v1156_v30 = vld [vmem:[#allocation6 + $0xa8] sm:$0xff] }
 0x69a   :  { %2725 = vmatmul.mubr.msk.f32.gmra.mxu1 %vm1186_vm4, %v1147_v36 }
 0x69b   :  { %2727 = vmatprep.mubr.msk.f32.mxu1 %vm1186_vm4, %v1148_v4  ;;  %v1155_v4 = vld [vmem:[#allocation6 + $0xa0] sm:$0xff] }
 0x69e   :  { %2728 = vmatmul.mubr.msk.f32.gmra.mxu1 %vm1186_vm4, %v1149_v37 }
 0x73a   :  { %v2659_v56 = vpop.f32.mrf.mxu1 }
 0x73b   :  { %v3308_v57 = vadd.f32 %v2659_v56, %v2148_v55 }
 0x73c   :  { %v1018_v58 = vpop.f32.mrf.mxu1 }
 0x73d   :  { %v1019_v59 = vadd.f32 %v2148_v55, %v1018_v58 }
 0x73f   :  { %2762 = vmatprep.mubr.f32.mxu1 %v1019_v59 }
 0x742   :  { %v3310_v60 = vpop.f32.mrf.mxu1 }
 0x743   :  { %v1381_v44 = vmul.f32 %v3310_v60, %v1152_v43  ;;  %v1872_v43 = vld [vmem:[#allocation2 + $0x340] sm:$0xff] }
 0x744   :  { %v3312_v61 = vpop.f32.mrf.mxu1 }
 0x745   :  { %v1380_v46 = vmul.f32 %v3312_v61, %v1151_v45  ;;  %v1870_v45 = vld [vmem:[#allocation2 + $0x330] sm:$0xff] }
 0x746   :  { %v3314_v62 = vpop.f32.mrf.mxu1 }
 0x747   :  { %v3367_v39 = vmul.f32 %v3314_v62, %v1154_v38  ;;  %v1738_v62 = vld [vmem:[#allocation2 + $0x2f8] sm:$0xff]  ;;  %v1876_v38 = vld [vmem:[#allocation2 + $0x360] sm:$0xff] }
 0x748   :  { %v3316_v63 = vpop.f32.mrf.mxu1 }
 0x749   :  { %v3372_v42 = vmul.f32 %v3316_v63, %v1153_v41  ;;  %v1874_v41 = vld [vmem:[#allocation2 + $0x350] sm:$0xff] }
 0x74a   :  { %v2714_v0 = vpop.f32.mrf.mxu1 }
 0x74b   :  { %v3358_v36 = vmul.f32 %v2714_v0, %v1156_v30 }
 0x74c   :  { %v1321_v1 = vpop.f32.mrf.mxu1 }
 0x74d   :  { %v3362_v37 = vmul.f32 %v1321_v1, %v1155_v4 }
 0x74e   :  { %v2717_v2 = vpop.f32.mrf.mxu1 }
 0x74f   :  { %v3350_v33 = vmul.f32 %v2717_v2, %v1158_v32 }
 0x750   :  { %v1331_v3 = vpop.f32.mrf.mxu1 }
 0x751   :  { %v3354_v35 = vmul.f32 %v1331_v3, %v1157_v34 }
 0x752   :  { %v2720_v5 = vpop.f32.mrf.mxu1 }
 0x753   :  { %v3342_v28 = vmul.f32 %v2720_v5, %v1160_v27 }
 0x754   :  { %v1341_v6 = vpop.f32.mrf.mxu1 }
 0x755   :  { %v3346_v31 = vmul.f32 %v1341_v6, %v1159_v29  ;;  %v1737_v6 = vld [vmem:[#allocation2 + $0x2f0] sm:$0xff] }
 0x756   :  { %v2723_v7 = vpop.f32.mrf.mxu1 }
 0x757   :  { %v3334_v24 = vmul.f32 %v2723_v7, %v1162_v23  ;;  %v1736_v7 = vld [vmem:[#allocation2 + $0x2e8] sm:$0xff] }
 0x758   :  { %v1351_v8 = vpop.f32.mrf.mxu1 }
 0x759   :  { %v3338_v26 = vmul.f32 %v1351_v8, %v1161_v25  ;;  %v1735_v8 = vld [vmem:[#allocation2 + $0x2e0] sm:$0xff] }
 0x75a   :  { %v2726_v9 = vpop.f32.mrf.mxu1 }
 0x75b   :  { %v3326_v18 = vmul.f32 %v2726_v9, %v1164_v17  ;;  %v1734_v9 = vld [vmem:[#allocation2 + $0x2d8] sm:$0xff] }
 0x75c   :  { %v1361_v10 = vpop.f32.mrf.mxu1  ;;  %v1726_v17 = vld [vmem:[#allocation2 + $0x298] sm:$0xff] }
 0x75d   :  { %v3330_v22 = vmul.f32 %v1361_v10, %v1163_v20  ;;  %v1733_v10 = vld [vmem:[#allocation2 + $0x2d0] sm:$0xff]  ;;  %v1724_v20 = vld [vmem:[#allocation2 + $0x288] sm:$0xff] }
 0x75e   :  { %v2729_v12 = vpop.f32.mrf.mxu1 }
 0x75f   :  { %v3318_v14 = vmul.f32 %v2729_v12, %v1166_v11  ;;  %v1732_v11 = vld [vmem:[#allocation2 + $0x2c8] sm:$0xff]  ;;  %v1731_v12 = vld [vmem:[#allocation2 + $0x2c0] sm:$0xff] }
 0x760   :  { %v1371_v15 = vpop.f32.mrf.mxu1 }
 0x761   :  { %v3320_v16 = vmul.f32 %v1371_v15, %v1165_v13  ;;  %2730 = vmatprep.subr.mxu1 %v3318_v14  ;;  %2800 = vmatprep.subr.mxu0 %v3318_v14  ;;  %v1730_v13 = vld [vmem:[#allocation2 + $0x2b8] sm:$0xff]  ;;  %v1728_v15 = vld [vmem:[#allocation2 + $0x2a8] sm:$0xff] }
 0x762   :  { %2731 = vmatpush3.xpose.msra.mxu1 %v3318_v14 }
 0x763   :  { %2732 = vmatprep.subr.mxu1 %v3320_v16 }
 0x766   :  { %2733 = vmatpush3.xpose.msra.mxu1 %v3320_v16 }
 0x767   :  { %2734 = vmatprep.subr.mxu1 %v3326_v18 }
 0x76a   :  { %2735 = vmatpush3.xpose.msra.mxu1 %v3326_v18 }
 0x76b   :  { %2736 = vmatprep.subr.mxu1 %v3330_v22 }
 0x76e   :  { %2737 = vmatpush3.xpose.msra.mxu1 %v3330_v22 }
 0x76f   :  { %2738 = vmatprep.subr.mxu1 %v3334_v24 }
 0x772   :  { %2739 = vmatpush3.xpose.msra.mxu1 %v3334_v24 }
 0x773   :  { %2740 = vmatprep.subr.mxu1 %v3338_v26 }
 0x776   :  { %2741 = vmatpush3.xpose.msra.mxu1 %v3338_v26 }
 0x777   :  { %2742 = vmatprep.subr.mxu1 %v3342_v28 }
 0x77a   :  { %2743 = vmatpush3.xpose.msra.mxu1 %v3342_v28 }
 0x77b   :  { %2744 = vmatprep.subr.mxu1 %v3346_v31 }
 0x77e   :  { %2745 = vmatpush3.xpose.msra.mxu1 %v3346_v31 }
 0x77f   :  { %2746 = vmatprep.subr.mxu1 %v3350_v33 }
 0x782   :  { %2747 = vmatpush3.xpose.msra.mxu1 %v3350_v33 }
 0x783   :  { %2748 = vmatprep.subr.mxu1 %v3354_v35 }
 0x786   :  { %2749 = vmatpush3.xpose.msra.mxu1 %v3354_v35 }
 0x787   :  { %2750 = vmatprep.subr.mxu1 %v3358_v36 }
 0x78a   :  { %2751 = vmatpush3.xpose.msra.mxu1 %v3358_v36 }
 0x78b   :  { %2752 = vmatprep.subr.mxu1 %v3362_v37 }
 0x78e   :  { %2753 = vmatpush3.xpose.msra.mxu1 %v3362_v37 }
 0x78f   :  { %2754 = vmatprep.subr.mxu1 %v3367_v39 }
 0x792   :  { %2755 = vmatpush3.xpose.msra.mxu1 %v3367_v39 }
 0x793   :  { %2756 = vmatprep.subr.mxu1 %v3372_v42 }
 0x796   :  { %2757 = vmatpush3.xpose.msra.mxu1 %v3372_v42 }
 0x797   :  { %2758 = vmatprep.subr.mxu1 %v1381_v44 }
 0x79a   :  { %2759 = vmatpush3.xpose.msra.mxu1 %v1381_v44 }
 0x79b   :  { %2760 = vmatprep.subr.mxu1 %v1380_v46 }
 0x79e   :  { %2761 = vmatpush3.xpose.msra.mxu1 %v1380_v46 }
 0x79f   :  { %2835 = vmatprep.subr.msk.mxu1 %vm708_vm2, %v3238_v40 }
 0x7a1   :  { %2763 = vmatmul.mubr.f32.vlgmr.msra.gmra.mxu1 %v3308_v57 }
 0x7a2   :  { %2836 = vmatpush3.msk.msra.mxu1 %vm708_vm2, %v3238_v40 }
 0x7a3   :  { %2840 = vmatprep.subr.mxu1 %v1738_v62 }
 0x861   :  { %v2764_v47 = vpop.f32.mrf.mxu1 }
 0x862   :  { %v1472_v49 = vmul.f32 0.35355338, %v2764_v47  ;;  %v1868_v47 = vld [vmem:[#allocation2 + $0x320] sm:$0xff] }
 0x863   :  { %v1462_v50 = vpop.f32.mrf.mxu1 }
 0x864   :  { %v1471_v52 = vmul.f32 0.35355338, %v1462_v50  ;;  %v1474_v53 = vadd.f32 %v1472_v49, %v1185_v48  ;;  %v1867_v48 = vld [vmem:[#allocation2 + $0x318] sm:$0xff]  ;;  %v1866_v49 = vld [vmem:[#allocation2 + $0x310] sm:$0xff]  ;;  %v1865_v50 = vld [vmem:[#allocation2 + $0x308] sm:$0xff] }
 0x866   :  { %1477 = vmax.xlane.f32.xlu1 %v1474_v53  ;;  %v1473_v54 = vadd.f32 %v1471_v52, %v1184_v51  ;;  %v1864_v51 = vld [vmem:[#allocation2 + $0x300] sm:$0xff]  ;;  %v1978_v52 = vld [vmem:[#allocation2 + $0x3f8] sm:$0xff] }
 0x868   :  { %1475 = vmax.xlane.f32.xlu0 %v1473_v54 }
 0x8ef   :  { %v1478_v55 = vpop.xlane.xlu1 %1477 }
 0x8f0   :  { %v1480_v56 = vsub.f32 %v1474_v53, %v1478_v55  ;;  %v1977_v53 = vld [vmem:[#allocation2 + $0x3f0] sm:$0xff]  ;;  %v1975_v55 = vld [vmem:[#allocation2 + $0x3e0] sm:$0xff] }
 0x8f1   :  { %v1476_v58 = vpop.xlane.xlu0 %1475 }
 0x8f2   :  { %v1479_v59 = vsub.f32 %v1473_v54, %v1476_v58  ;;  %v1483_v60 = vmul.f32 1.442695, %v1480_v56  ;;  %v1976_v54 = vld [vmem:[#allocation2 + $0x3e8] sm:$0xff]  ;;  %v1974_v56 = vld [vmem:[#allocation2 + $0x3d8] sm:$0xff]  ;;  %v1973_v58 = vld [vmem:[#allocation2 + $0x3d0] sm:$0xff] }
 0x8f4   :  { %v1481_v61 = vmul.f32 1.442695, %v1479_v59  ;;  %v1972_v59 = vld [vmem:[#allocation2 + $0x3c8] sm:$0xff] }
 0x8f6   :  { %2963 = vpow2.f32 %v1481_v61  ;;  %v1970_v61 = vld [vmem:[#allocation2 + $0x3b8] sm:$0xff] }
 0x8f7   :  { %2965 = vpow2.f32 %v1483_v60  ;;  %v1971_v60 = vld [vmem:[#allocation2 + $0x3c0] sm:$0xff] }
 0x903   :  { %v2964_v57 = vpop.eup %2963 }
 0x904   :  { %v2966_v40 = vpop.eup %2965  ;;  %2797 = vmatprep.mubr.f32.mxu0 %v2964_v57 }
 0x905   :  { %2798 = vmatmul.mubr.f32.vlgmr.msra.gmra.mxu0 %v2966_v40 }
 0x906   :  { %2801 = vmatpush3.msra.mxu0 %v3318_v14  ;;  %2832 = vmatprep.mubr.f32.mxu0 %v2964_v57  ;;  %v1729_v14 = vld [vmem:[#allocation2 + $0x2b0] sm:$0xff] }
 0x907   :  { %2802 = vmatprep.subr.mxu0 %v3320_v16  ;;  %v1969_v57 = vld [vmem:[#allocation2 + $0x3b0] sm:$0xff] }
 0x908   :  { %2803 = vmatpush3.msra.mxu0 %v3320_v16  ;;  %v1727_v16 = vld [vmem:[#allocation2 + $0x2a0] sm:$0xff] }
 0x909   :  { %2804 = vmatprep.subr.mxu0 %v3326_v18 }
 0x90a   :  { %2805 = vmatpush3.msra.mxu0 %v3326_v18  ;;  %v1725_v18 = vld [vmem:[#allocation2 + $0x290] sm:$0xff] }
 0x90b   :  { %2806 = vmatprep.subr.mxu0 %v3330_v22 }
 0x90c   :  { %2807 = vmatpush3.msra.mxu0 %v3330_v22  ;;  %v1723_v22 = vld [vmem:[#allocation2 + $0x280] sm:$0xff] }
 0x90d   :  { %2808 = vmatprep.subr.mxu0 %v3334_v24 }
 0x90e   :  { %2809 = vmatpush3.msra.mxu0 %v3334_v24 }
 0x90f   :  { %2810 = vmatprep.subr.mxu0 %v3338_v26 }
 0x910   :  { %2811 = vmatpush3.msra.mxu0 %v3338_v26 }
 0x911   :  { %2812 = vmatprep.subr.mxu0 %v3342_v28 }
 0x912   :  { %2813 = vmatpush3.msra.mxu0 %v3342_v28 }
 0x913   :  { %2814 = vmatprep.subr.mxu0 %v3346_v31 }
 0x914   :  { %2815 = vmatpush3.msra.mxu0 %v3346_v31  ;;  %v2169_v31 = vld [vmem:[#allocation4 + $0x5] ss:$0 sm:$0xff] }
 0x915   :  { %2816 = vmatprep.subr.mxu0 %v3350_v33 }
 0x916   :  { %2817 = vmatpush3.msra.mxu0 %v3350_v33 }
 0x917   :  { %2818 = vmatprep.subr.mxu0 %v3354_v35 }
 0x918   :  { %2819 = vmatpush3.msra.mxu0 %v3354_v35 }
 0x919   :  { %2820 = vmatprep.subr.mxu0 %v3358_v36 }
 0x91a   :  { %2821 = vmatpush3.msra.mxu0 %v3358_v36 }
 0x91b   :  { %2822 = vmatprep.subr.mxu0 %v3362_v37 }
 0x91c   :  { %2823 = vmatpush3.msra.mxu0 %v3362_v37  ;;  %v1878_v37 = vld [vmem:[#allocation2 + $0x370] sm:$0xff] }
 0x91d   :  { %2824 = vmatprep.subr.mxu0 %v3367_v39 }
 0x91e   :  { %2825 = vmatpush3.msra.mxu0 %v3367_v39  ;;  %v1875_v39 = vld [vmem:[#allocation2 + $0x358] sm:$0xff] }
 0x91f   :  { %2826 = vmatprep.subr.mxu0 %v3372_v42 }
 0x920   :  { %2827 = vmatpush3.msra.mxu0 %v3372_v42  ;;  %v1873_v42 = vld [vmem:[#allocation2 + $0x348] sm:$0xff] }
 0x921   :  { %2828 = vmatprep.subr.mxu0 %v1381_v44 }
 0x922   :  { %2829 = vmatpush3.msra.mxu0 %v1381_v44  ;;  %v1871_v44 = vld [vmem:[#allocation2 + $0x338] sm:$0xff] }
 0x923   :  { %2830 = vmatprep.subr.mxu0 %v1380_v46 }
 0x924   :  { %2831 = vmatpush3.msra.mxu0 %v1380_v46  ;;  %v1869_v46 = vld [vmem:[#allocation2 + $0x328] sm:$0xff] }
 0x925   :  { %2833 = vmatmul.mubr.f32.vlgmr.msra.gmra.mxu0 %v2966_v40  ;;  %v1968_v40 = vld [vmem:[#allocation2 + $0x3a8] sm:$0xff] }
 0x9c5   :  { %v2799_v63 = vpop.f32.mrf.mxu0 }
 0x9c6   :  { %v1561_v0 = vmax.f32 %v2799_v63, 1e-30 }
 0x9c7   :  { %v1551_v1 = vpop.f32.mrf.mxu0 }
 0x9c8   :  { %v1560_v2 = vmax.f32 %v1551_v1, 1e-30 }
 0x9ca   :  { %2967 = vrcp.f32 %v1560_v2 }
 0x9cb   :  { %2969 = vrcp.f32 %v1561_v0 }
 0x9d7   :  { %v2968_v3 = vpop.eup %2967 }
 0x9d8   :  { %v2970_v5 = vpop.eup %2969  ;;  %2837 = vmatprep.mubr.msk.f32.mxu1 %vm701_vm3, %v2968_v3 }
 0x9d9   :  { %2838 = vmatmul.mubr.msk.f32.vlgmr.msra.gmra.mxu1 %vm701_vm3, %v2970_v5 }
 0x9da   :  { %2841 = vmatpush3.msra.mxu1 %v1738_v62  ;;  %v1967_v62 = vld [vmem:[#allocation2 + $0x3a0] sm:$0xff] }
 0x9db   :  { %2842 = vmatprep.subr.mxu1 %v1737_v6 }
 0x9dc   :  { %2843 = vmatpush3.msra.mxu1 %v1737_v6 }
 0x9dd   :  { %2844 = vmatprep.subr.mxu1 %v1736_v7 }
 0x9de   :  { %2845 = vmatpush3.msra.mxu1 %v1736_v7 }
 0x9df   :  { %2846 = vmatprep.subr.mxu1 %v1735_v8 }
 0x9e0   :  { %2847 = vmatpush3.msra.mxu1 %v1735_v8 }
 0x9e1   :  { %2848 = vmatprep.subr.mxu1 %v1734_v9 }
 0x9e2   :  { %2849 = vmatpush3.msra.mxu1 %v1734_v9 }
 0x9e3   :  { %2850 = vmatprep.subr.mxu1 %v1733_v10 }
 0x9e4   :  { %2851 = vmatpush3.msra.mxu1 %v1733_v10 }
 0x9e5   :  { %2852 = vmatprep.subr.mxu1 %v1732_v11  ;;  %v2834_v23 = vpop.f32.mrf.mxu0 }
 0x9e6   :  { %2853 = vmatpush3.msra.mxu1 %v1732_v11 }
 0x9e7   :  { %2854 = vmatprep.subr.mxu1 %v1731_v12  ;;  %v1630_v25 = vpop.f32.mrf.mxu0 }
 0x9e8   :  { %2855 = vmatpush3.msra.mxu1 %v1731_v12 }
 0x9e9   :  { %2856 = vmatprep.subr.mxu1 %v1730_v13 }
 0x9ea   :  { %2857 = vmatpush3.msra.mxu1 %v1730_v13 }
 0x9eb   :  { %2858 = vmatprep.subr.mxu1 %v1729_v14 }
 0x9ec   :  { %2859 = vmatpush3.msra.mxu1 %v1729_v14 }
 0x9ed   :  { %2860 = vmatprep.subr.mxu1 %v1728_v15 }
 0x9ee   :  { %2861 = vmatpush3.msra.mxu1 %v1728_v15 }
 0x9ef   :  { %2862 = vmatprep.subr.mxu1 %v1727_v16 }
 0x9f0   :  { %2863 = vmatpush3.msra.mxu1 %v1727_v16 }
 0x9f1   :  { %2864 = vmatprep.subr.mxu1 %v1726_v17 }
 0x9f2   :  { %2865 = vmatpush3.msra.mxu1 %v1726_v17 }
 0x9f3   :  { %2866 = vmatprep.subr.mxu1 %v1725_v18 }
 0x9f4   :  { %2867 = vmatpush3.msra.mxu1 %v1725_v18  ;;  %v2170_v18 = vld [vmem:[#allocation4 + $0xa] ss:$0 sm:$0xff] }
 0x9f5   :  { %2868 = vmatprep.subr.mxu1 %v1724_v20 }
 0x9f6   :  { %2869 = vmatpush3.msra.mxu1 %v1724_v20 }
 0x9f7   :  { %2870 = vmatprep.subr.mxu1 %v1723_v22 }
 0x9f8   :  { %2871 = vmatpush3.msra.mxu1 %v1723_v22 }
 0x9f9   :  { %2910 = vmatprep.subr.mxu1 %v1978_v52 }
 0xa99   :  { %v2839_v24 = vpop.f32.mrf.mxu1 }
 0xa9a   :  { %v1721_v28 = vmul.f32 %v2839_v24, %v2834_v23 }
 0xa9b   :  { %v1711_v26 = vpop.f32.mrf.mxu1 }
 0xa9c   :  { %v1720_v27 = vmul.f32 %v1711_v26, %v1630_v25  ;;  %v2171_v25 = vld [vmem:[#allocation4 + $0xb] ss:$0 sm:$0xff] }
 0xa9e   :  { %2872 = vmatprep.mubr.f32.mxu1 %v1720_v27 }
 0xa9f   :  { %2873 = vmatmul.mubr.f32.vlgmr.msra.gmra.mxu1 %v1721_v28  ;;  %v1966_v28 = vld [vmem:[#allocation2 + $0x398] sm:$0xff] }
 0xaa0   :  { %2911 = vmatpush3.msra.mxu1 %v1978_v52 }
 0xaa1   :  { %2912 = vmatprep.subr.mxu1 %v1977_v53 }
 0xaa2   :  { %2913 = vmatpush3.msra.mxu1 %v1977_v53 }
 0xaa3   :  { %2914 = vmatprep.subr.mxu1 %v1976_v54 }
 0xaa4   :  { %2915 = vmatpush3.msra.mxu1 %v1976_v54 }
 0xaa5   :  { %2916 = vmatprep.subr.mxu1 %v1975_v55 }
 0xaa6   :  { %2917 = vmatpush3.msra.mxu1 %v1975_v55 }
 0xaa7   :  { %2918 = vmatprep.subr.mxu1 %v1974_v56 }
 0xaa8   :  { %2919 = vmatpush3.msra.mxu1 %v1974_v56 }
 0xaa9   :  { %2920 = vmatprep.subr.mxu1 %v1973_v58 }
 0xaaa   :  { %2921 = vmatpush3.msra.mxu1 %v1973_v58 }
 0xaab   :  { %2922 = vmatprep.subr.mxu1 %v1972_v59 }
 0xaac   :  { %2923 = vmatpush3.msra.mxu1 %v1972_v59 }
 0xaad   :  { %2924 = vmatprep.subr.mxu1 %v1971_v60 }
 0xaae   :  { %2925 = vmatpush3.msra.mxu1 %v1971_v60 }
 0xaaf   :  { %2926 = vmatprep.subr.mxu1 %v1970_v61 }
 0xab0   :  { %2927 = vmatpush3.msra.mxu1 %v1970_v61 }
 0xab1   :  { %2928 = vmatprep.subr.mxu1 %v1969_v57 }
 0xab2   :  { %2929 = vmatpush3.msra.mxu1 %v1969_v57 }
 0xab3   :  { %2930 = vmatprep.subr.mxu1 %v1968_v40 }
 0xab4   :  { %2931 = vmatpush3.msra.mxu1 %v1968_v40  ;;  %v2174_v40 = vld [vmem:[#allocation4 + $0xc] ss:$0 sm:$0xff] }
 0xab5   :  { %2932 = vmatprep.subr.mxu1 %v1967_v62 }
 0xab6   :  { %2933 = vmatpush3.msra.mxu1 %v1967_v62 }
 0xab7   :  { %2934 = vmatprep.subr.mxu1 %v1966_v28 }
 0xab8   :  { %2935 = vmatpush3.msra.mxu1 %v1966_v28 }
 0xb5f   :  { %v2874_v29 = vpop.f32.mrf.mxu1 }
 0xb60   :  { %v1815_v32 = vadd.f32 %v2874_v29, %v3283_v21  ;;  %v1879_v21 = vld [vmem:[#allocation2 + $0x378] sm:$0xff]  ;;  %v1965_v29 = vld [vmem:[#allocation2 + $0x390] sm:$0xff] }
 0xb61   :  { %v1805_v33 = vpop.f32.mrf.mxu1  ;;  %2875 = vmatprep.subr.mxu0 %v1879_v21  ;;  %2936 = vmatprep.subr.mxu1 %v1965_v29 }
 0xb62   :  { %v3414_v34 = vadd.f32 %v2169_v31, %v1815_v32  ;;  %v1814_v35 = vadd.f32 %v1805_v33, %v3281_v19  ;;  %2876 = vmatpush3.msra.mxu0 %v1879_v21  ;;  %v1877_v19 = vld [vmem:[#allocation2 + $0x368] sm:$0xff]  ;;  %2937 = vmatpush3.msra.mxu1 %v1965_v29  ;;  %v1963_v32 = vld [vmem:[#allocation2 + $0x380] sm:$0xff] }
 0xb63   :  { %2877 = vmatprep.subr.mxu0 %v1878_v37  ;;  %v2172_v33 = vld [vmem:[#allocation4 + $0x6] ss:$0 sm:$0xff] }
 0xb64   :  { %v3417_v30 = vadd.f32 %v2169_v31, %v1814_v35  ;;  %1825 = vadd.xlane.f32.xlu1 %v3414_v34  ;;  %v1830_v36 = vmul.f32 %v3414_v34, %v3414_v34  ;;  %2878 = vmatpush3.msra.mxu0 %v1878_v37  ;;  %v1964_v31 = vld [vmem:[#allocation2 + $0x388] sm:$0xff] }
 0xb65   :  { %2879 = vmatprep.subr.mxu0 %v1877_v19  ;;  %2938 = vmatprep.subr.mxu1 %v1964_v31 }
 0xb66   :  { %1823 = vadd.xlane.f32.xlu0 %v3417_v30  ;;  %v1829_v4 = vmul.f32 %v3417_v30, %v3417_v30  ;;  %2880 = vmatpush3.msra.mxu0 %v1877_v19  ;;  %v2173_v19 = vld [vmem:[#allocation4 + $0x7] ss:$0 sm:$0xff] }
 0xb67   :  { %2881 = vmatprep.subr.mxu0 %v1876_v38  ;;  %2939 = vmatpush3.msra.mxu1 %v1964_v31 }
 0xb68   :  { %1833 = vadd.xlane.f32.xlu1 %v1830_v36  ;;  %2882 = vmatpush3.msra.mxu0 %v1876_v38 }
 0xb69   :  { %2883 = vmatprep.subr.mxu0 %v1875_v39  ;;  %2940 = vmatprep.subr.mxu1 %v1963_v32 }
 0xb6a   :  { %1831 = vadd.xlane.f32.xlu0 %v1829_v4  ;;  %2884 = vmatpush3.msra.mxu0 %v1875_v39 }
 0xb6b   :  { %2885 = vmatprep.subr.mxu0 %v1874_v41  ;;  %2941 = vmatpush3.msra.mxu1 %v1963_v32 }
 0xb6c   :  { %2886 = vmatpush3.msra.mxu0 %v1874_v41 }
 0xb6d   :  { %2887 = vmatprep.subr.mxu0 %v1873_v42 }
 0xb6e   :  { %2888 = vmatpush3.msra.mxu0 %v1873_v42 }
 0xb6f   :  { %2889 = vmatprep.subr.mxu0 %v1872_v43 }
 0xb70   :  { %2890 = vmatpush3.msra.mxu0 %v1872_v43 }
 0xb71   :  { %2891 = vmatprep.subr.mxu0 %v1871_v44 }
 0xb72   :  { %2892 = vmatpush3.msra.mxu0 %v1871_v44 }
 0xb73   :  { %2893 = vmatprep.subr.mxu0 %v1870_v45 }
 0xb74   :  { %2894 = vmatpush3.msra.mxu0 %v1870_v45 }
 0xb75   :  { %2895 = vmatprep.subr.mxu0 %v1869_v46 }
 0xb76   :  { %2896 = vmatpush3.msra.mxu0 %v1869_v46 }
 0xb77   :  { %2897 = vmatprep.subr.mxu0 %v1868_v47 }
 0xb78   :  { %2898 = vmatpush3.msra.mxu0 %v1868_v47 }
 0xb79   :  { %2899 = vmatprep.subr.mxu0 %v1867_v48 }
 0xb7a   :  { %2900 = vmatpush3.msra.mxu0 %v1867_v48 }
 0xb7b   :  { %2901 = vmatprep.subr.mxu0 %v1866_v49 }
 0xb7c   :  { %2902 = vmatpush3.msra.mxu0 %v1866_v49 }
 0xb7d   :  { %2903 = vmatprep.subr.mxu0 %v1865_v50 }
 0xb7e   :  { %2904 = vmatpush3.msra.mxu0 %v1865_v50 }
 0xb7f   :  { %2905 = vmatprep.subr.mxu0 %v1864_v51 }
 0xb80   :  { %2906 = vmatpush3.msra.mxu0 %v1864_v51 }
 0xbed   :  { %v1826_v63 = vpop.xlane.xlu1 %1825 }
 0xbee   :  { %v1828_v0 = vmul.f32 0.03125, %v1826_v63 }
 0xbef   :  { %v1824_v1 = vpop.xlane.xlu0 %1823 }
 0xbf0   :  { %v1827_v2 = vmul.f32 0.03125, %v1824_v1  ;;  %v1840_v5 = vmul.f32 %v1828_v0, %v1828_v0  ;;  %v1838_v14 = vsub.f32 %v3414_v34, %v1828_v0  ;;  %v2175_v1 = vld [vmem:[#allocation4 + $0xd] ss:$0 sm:$0xff] }
 0xbf1   :  { %v1834_v3 = vpop.xlane.xlu1 %1833 }
 0xbf2   :  { %v1836_v6 = vmul.f32 0.03125, %v1834_v3  ;;  %v1839_v8 = vmul.f32 %v1827_v2, %v1827_v2  ;;  %v1837_v16 = vsub.f32 %v3417_v30, %v1827_v2 }
 0xbf3   :  { %v1832_v7 = vpop.xlane.xlu0 %1831 }
 0xbf4   :  { %v1842_v9 = vsub.f32 %v1836_v6, %v1840_v5  ;;  %v1835_v10 = vmul.f32 0.03125, %v1832_v7 }
 0xbf6   :  { %v1844_v11 = vadd.f32 1e-05, %v1842_v9  ;;  %v1841_v12 = vsub.f32 %v1835_v10, %v1839_v8 }
 0xbf8   :  { %2971 = vrsqrt.f32 %v1844_v11  ;;  %v1843_v13 = vadd.f32 1e-05, %v1841_v12 }
 0xbfa   :  { %2973 = vrsqrt.f32 %v1843_v13 }
 0xc05   :  { %v2972_v15 = vpop.eup %2971 }
 0xc06   :  { %v1848_v17 = vmul.f32 %v2972_v15, %v1838_v14 }
 0xc07   :  { %v2974_v20 = vpop.eup %2973 }
 0xc08   :  { %v1847_v22 = vmul.f32 %v2974_v20, %v1837_v16  ;;  %v1855_v23 = vmul.f32 %v2170_v18, %v1848_v17 }
 0xc0a   :  { %v1854_v24 = vmul.f32 %v2170_v18, %v1847_v22  ;;  %v1862_v27 = vadd.f32 %v2171_v25, %v1855_v23 }
 0xc0c   :  { %v1861_v26 = vadd.f32 %v2171_v25, %v1854_v24 }
 0xc0e   :  { %2907 = vmatprep.mubr.f32.mxu0 %v1861_v26 }
 0xc0f   :  { %2908 = vmatmul.mubr.f32.vlgmr.msra.gmra.mxu0 %v1862_v27 }
 0xccf   :  { %v2909_v34 = vpop.f32.mrf.mxu0 }
 0xcd0   :  { %v1957_v35 = vadd.f32 %v2909_v34, %v2172_v33 }
 0xcd1   :  { %v1951_v30 = vpop.f32.mrf.mxu0 }
 0xcd2   :  { %v1952_v36 = vadd.f32 %v2172_v33, %v1951_v30  ;;  %v1961_v21 = vmax.f32 %v1957_v35, 0.0 }
 0xcd4   :  { %v1960_v4 = vmax.f32 %v1952_v36, 0.0 }
 0xcd6   :  { %2942 = vmatprep.mubr.f32.mxu1 %v1960_v4 }
 0xcd7   :  { %2943 = vmatmul.mubr.f32.vlgmr.msra.gmra.mxu1 %v1961_v21 }
 0xd97   :  { %v2944_v37 = vpop.f32.mrf.mxu1 }
 0xd98   :  { %v2055_v38 = vadd.f32 %v2944_v37, %v1862_v27 }
 0xd99   :  { %v2045_v39 = vpop.f32.mrf.mxu1 }
 0xd9a   :  { %v2062_v41 = vadd.f32 %v2173_v19, %v2055_v38  ;;  %v2054_v42 = vadd.f32 %v2045_v39, %v1861_v26 }
 0xd9c   :  { %v2061_v43 = vadd.f32 %v2173_v19, %v2054_v42  ;;  %2065 = vadd.xlane.f32.xlu1 %v2062_v41  ;;  %v2070_v44 = vmul.f32 %v2062_v41, %v2062_v41 }
 0xd9e   :  { %2063 = vadd.xlane.f32.xlu0 %v2061_v43  ;;  %v2069_v45 = vmul.f32 %v2061_v43, %v2061_v43 }
 0xda0   :  { %2073 = vadd.xlane.f32.xlu1 %v2070_v44 }
 0xda2   :  { %2071 = vadd.xlane.f32.xlu0 %v2069_v45 }
 0xe25   :  { %v2066_v46 = vpop.xlane.xlu1 %2065 }
 0xe26   :  { %v2068_v47 = vmul.f32 0.03125, %v2066_v46 }
 0xe27   :  { %v2064_v48 = vpop.xlane.xlu0 %2063 }
 0xe28   :  { %v2067_v49 = vmul.f32 0.03125, %v2064_v48  ;;  %v2080_v51 = vmul.f32 %v2068_v47, %v2068_v47  ;;  %v2078_v61 = vsub.f32 %v2062_v41, %v2068_v47 }
 0xe29   :  { %v2074_v50 = vpop.xlane.xlu1 %2073 }
 0xe2a   :  { %v2076_v52 = vmul.f32 0.03125, %v2074_v50  ;;  %v2079_v54 = vmul.f32 %v2067_v49, %v2067_v49  ;;  %v2077_v62 = vsub.f32 %v2061_v43, %v2067_v49 }
 0xe2b   :  { %v2072_v53 = vpop.xlane.xlu0 %2071 }
 0xe2c   :  { %v2082_v55 = vsub.f32 %v2076_v52, %v2080_v51  ;;  %v2075_v56 = vmul.f32 0.03125, %v2072_v53 }
 0xe2e   :  { %v2084_v58 = vadd.f32 1e-05, %v2082_v55  ;;  %v2081_v59 = vsub.f32 %v2075_v56, %v2079_v54 }
 0xe30   :  { %2975 = vrsqrt.f32 %v2084_v58  ;;  %v2083_v60 = vadd.f32 1e-05, %v2081_v59 }
 0xe32   :  { %2977 = vrsqrt.f32 %v2083_v60 }
 0xe3d   :  { %v2976_v57 = vpop.eup %2975 }
 0xe3e   :  { %v2088_v63 = vmul.f32 %v2976_v57, %v2078_v61 }
 0xe3f   :  { %v2978_v0 = vpop.eup %2977 }
 0xe40   :  { %v2095_v2 = vmul.f32 %v2174_v40, %v2088_v63  ;;  %v2087_v3 = vmul.f32 %v2978_v0, %v2077_v62 }
 0xe42   :  { %v2102_v5 = vadd.f32 %v2175_v1, %v2095_v2  ;;  %v2094_v6 = vmul.f32 %v2174_v40, %v2087_v3 }
 0xe44   :  { %2104 = vst [vmem:[%s3440_s7 + $0x8] sm:$0xff] %v2102_v5  ;;  %v2101_v7 = vadd.f32 %v2175_v1, %v2094_v6 }
 0xe46   :  { %2103 = vst [vmem:[%s3440_s7] sm:$0xff] %v2101_v7 }
 0xe47   :  { %2109 = vsyncpa [#allocation3], 1 }
 0xe48   :  { %2110 = vsyncpa [#allocation5], 1 }
 0xe49   :  { %2111 = vsyncpa [#allocation8], 1 }

</bundles_post_ra>
